<compile_context>
chip_gen: v6e
topology: v6e:2x2x1
jax: 0.10.0
libtpu: 0.0.40
codegen_flags: <defaults>
</compile_context>

<pallas_src>
import math

import numpy as np

import jax
import jax.numpy as jnp
from jax.experimental import pallas as pl
from jax.experimental.pallas import tpu as pltpu


# ----------------------------------------------------------------------------
# In-kernel helpers: zero-padded row shifts via XLU roll + VPU mask
# ----------------------------------------------------------------------------
def _shift_down(y):
    """out[h] = y[h-1], out[0] = 0    (conv row tap dy=0, zero padded)."""
    rows = jax.lax.broadcasted_iota(jnp.int32, y.shape, 0)
    return jnp.where(rows == 0, 0.0, pltpu.roll(y, shift=1, axis=0))


def _shift_up(y):
    """out[h] = y[h+1], out[H-1] = 0  (conv row tap dy=2, zero padded)."""
    h = y.shape[0]
    rows = jax.lax.broadcasted_iota(jnp.int32, y.shape, 0)
    return jnp.where(rows == h - 1, 0.0, pltpu.roll(y, shift=h - 1, axis=0))


# ----------------------------------------------------------------------------
# The single fused kernel
# ----------------------------------------------------------------------------
def _upsampling_block_kernel(x_ref, fs_ref, h_ref,
                             uh_ref, bandx_ref, bandfs_ref, bias1_ref,
                             bihb_ref, bihh_ref, bhhb_ref, bhhr_ref,
                             bias_ih_ref, bias_hh_ref,
                             o_ref):
    """Fused UpsamplingBlock forward for one batch image.

    Channels-major lane-merged layout: every image is (H, C*W).
      x_ref:      (1, Hx, Cx*Wx)        bf16  half-resolution input x
      fs_ref:     (1, Hs, (Cf+Cs)*Ws)   bf16  concat[f, s]
      h_ref:      (1, Hs, half)         f32   previous hidden state (half = c2*Ws)
      uh_ref:     (Hs, Hx)              bf16  x2 bilinear H-upsample (+crop) matrix
      bandx_ref:  (Cx*Wx, 3*Cout*Ws)    bf16  W-upsample + conv col taps + BN scale,
                                              3 dy taps stacked along N
      bandfs_ref: ((Cf+Cs)*Ws, 3*Cout*Ws) bf16  conv bands for [f|s], BN folded,
                                              taps stacked along N
      bias1_ref:  (1, Cout*Ws)          f32   folded BN bias
      bihb/bihh:  (half, 3*2*half)      bf16  GRU ih-conv bands (b-half / h-half)
      bhhb/bhhr:  (half, 3*half)        bf16  GRU hh-conv bands (b-half / (r*h)-half)
      bias_ih:    (1, 2*half) f32 ; bias_hh: (1, half) f32
      o_ref:      (1, Hs, Cout*Ws)      f32   output = [a | h_new] (lane-dense);
                                              the recurrent state is its 2nd half.
    """
    n1 = o_ref.shape[2]        # Cout * Ws
    half = h_ref.shape[2]      # (Cout // 2) * Ws

    # ---- conv block: upsample2x(x) -> crop, conv3x3(concat[x, f, s]), BN, ReLU
    # f|s contribution: one K-stacked, tap-stacked bf16 matmul -> (Hs, 3*n1) f32.
    yfs = jnp.dot(fs_ref[0], bandfs_ref[...], preferred_element_type=jnp.float32)

    # x contribution: width-upsample + conv col taps folded into bandx, then the
    # height-upsample (+ crop / conv zero-pad) via a single bf16 U_H matmul.
    xy = jnp.dot(x_ref[0], bandx_ref[...], preferred_element_type=jnp.float32)
    y = yfs + jnp.dot(uh_ref[...], xy.astype(jnp.bfloat16),
                      preferred_element_type=jnp.float32)

    acc = (_shift_down(y[:, :n1]) + y[:, n1:2 * n1] + _shift_up(y[:, 2 * n1:])
           + bias1_ref[...])
    xc = jnp.maximum(acc, 0.0)                          # (Hs, n1) f32, never hits HBM

    a2d = xc[:, :half]
    b16 = xc[:, half:].astype(jnp.bfloat16)             # cast once, reused twice
    h2d = h_ref[0]
    h16 = h2d.astype(jnp.bfloat16)                      # cast once

    # ---- ConvGRU: rz = sigmoid(conv3x3(concat[b, h]) + bias)
    n2 = 2 * half
    yih = (jnp.dot(b16, bihb_ref[...], preferred_element_type=jnp.float32)
           + jnp.dot(h16, bihh_ref[...], preferred_element_type=jnp.float32))
    rz = jax.nn.sigmoid(_shift_down(yih[:, :n2]) + yih[:, n2:2 * n2]
                        + _shift_up(yih[:, 2 * n2:]) + bias_ih_ref[...])
    r = rz[:, :half]
    z = rz[:, half:]

    # ---- c = tanh(conv3x3(concat[b, r*h]) + bias)
    rh16 = (r * h2d).astype(jnp.bfloat16)
    yhh = (jnp.dot(b16, bhhb_ref[...], preferred_element_type=jnp.float32)
           + jnp.dot(rh16, bhhr_ref[...], preferred_element_type=jnp.float32))
    c = jnp.tanh(_shift_down(yhh[:, :half]) + yhh[:, half:2 * half]
                 + _shift_up(yhh[:, 2 * half:]) + bias_hh_ref[...])

    # ---- h_new and the final channel concat (lane-dense 128-lane store)
    h_new = (1.0 - z) * h2d + z * c
    o_ref[0] = jnp.concatenate([a2d, h_new], axis=-1)


# ----------------------------------------------------------------------------
# pallas_call wrapper
# ----------------------------------------------------------------------------
def _fused_block_call(x2d, fs2d, h2d, w):
    B, _, _ = x2d.shape
    _, Hs, _ = fs2d.shape
    n1 = w["bias1"].shape[1]

    def bspec(shape):
        return pl.BlockSpec((1,) + shape[1:], lambda b: (b, 0, 0))

    def wspec(arr):
        return pl.BlockSpec(arr.shape, lambda b: (0, 0))

    return pl.pallas_call(
        _upsampling_block_kernel,
        out_shape=jax.ShapeDtypeStruct((B, Hs, n1), jnp.float32),
        grid_spec=pltpu.PrefetchScalarGridSpec(
            num_scalar_prefetch=0,
            grid=(B,),
            in_specs=[bspec(x2d.shape), bspec(fs2d.shape), bspec(h2d.shape),
                      wspec(w["uh"]), wspec(w["bandx"]), wspec(w["bandfs"]),
                      wspec(w["bias1"]),
                      wspec(w["bihb"]), wspec(w["bihh"]),
                      wspec(w["bhhb"]), wspec(w["bhhr"]),
                      wspec(w["bias_ih"]), wspec(w["bias_hh"])],
            out_specs=pl.BlockSpec((1, Hs, n1), lambda b: (b, 0, 0)),
        ),
        compiler_params=pltpu.CompilerParams(dimension_semantics=("parallel",)),
    )(x2d, fs2d, h2d,
      w["uh"], w["bandx"], w["bandfs"], w["bias1"],
      w["bihb"], w["bihh"], w["bhhb"], w["bhhr"],
      w["bias_ih"], w["bias_hh"])


# ----------------------------------------------------------------------------
# Wrapper-side weight preprocessing (hoisted, done ONCE per parameter set)
# ----------------------------------------------------------------------------
def _bilinear_up2_matrix(n_in, n_out):
    """(n_out, n_in) matrix of a x2 bilinear upsample (align_corners=False,
    PyTorch edge clamping), already cropped to the first n_out output rows."""
    m = np.zeros((n_out, n_in), dtype=np.float32)
    for o in range(n_out):
        src = (o + 0.5) / 2.0 - 0.5
        f = int(math.floor(src))
        frac = src - f
        i0 = min(max(f, 0), n_in - 1)
        i1 = min(max(f + 1, 0), n_in - 1)
        m[o, i0] += 1.0 - frac
        m[o, i1] += frac
    return jnp.asarray(m)


def _make_band(wt, W):
    """wt: (3,3,Cin,Cout) HWIO -> (Cin*W, 3*Cout*W) banded matrix.

    Row index = ci*W + wi, col index = dy*(Cout*W) + co*W + wo (3 dy taps
    stacked along N).  Conv zero padding along W is baked in.
    """
    cin, cout = wt.shape[2], wt.shape[3]
    bands = []
    for dy in range(3):
        acc = None
        for dx in range(3):
            # sel[wi, wo] = 1 iff wi == wo + dx - 1 (valid taps only)
            sel = jnp.eye(W, W, k=1 - dx, dtype=wt.dtype)
            term = jnp.einsum('io,vw->ivow', wt[dy, dx], sel)
            acc = term if acc is None else acc + term
        bands.append(acc.reshape(cin * W, cout * W))
    return jnp.concatenate(bands, axis=-1)


def _make_band_upsampled(wt, U_W):
    """Banded matrix for conv3x3(width-upsampled x): folds the x2 bilinear
    width-upsample (U_W: (Ws, Wx)) and the conv column taps into one matrix,
    3 dy taps stacked along N.  Returns (Cin*Wx, 3*Cout*Ws)."""
    Ws, Wx = U_W.shape
    cin, cout = wt.shape[2], wt.shape[3]
    zrow = jnp.zeros((1, Wx), U_W.dtype)
    bands = []
    for dy in range(3):
        acc = None
        for dx in range(3):
            if dx == 0:       # uw_s[wo] = U_W[wo-1] (zero at wo=0)
                uw_s = jnp.concatenate([zrow, U_W[:-1]], axis=0)
            elif dx == 1:
                uw_s = U_W
            else:             # uw_s[wo] = U_W[wo+1] (zero at wo=Ws-1)
                uw_s = jnp.concatenate([U_W[1:], zrow], axis=0)
            term = jnp.einsum('io,vw->iwov', wt[dy, dx], uw_s)
            acc = term if acc is None else acc + term
        bands.append(acc.reshape(cin * Wx, cout * Ws))
    return jnp.concatenate(bands, axis=-1)


def prepare_block_weights(params, *, Cx, Cf, Cs, Cout, Hx, Wx, Hs, Ws,
                          bn_eps=1e-5):
    """Fold BN into the conv, build banded/upsample-folded weight matrices.
    Called once; the result is reused for every frame."""
    del Cf, Cs  # f|s bands are built from the stacked tail of conv_w directly
    c2 = Cout // 2

    w = params["conv_w"].astype(jnp.float32)
    bn_scale = params["bn_gamma"] / jnp.sqrt(params["bn_var"] + bn_eps)
    bn_bias = params["bn_beta"] - params["bn_mean"] * bn_scale
    w = w * bn_scale[None, None, None, :]
    wx, wfs = w[:, :, :Cx, :], w[:, :, Cx:, :]      # split x vs [f|s] along Cin

    U_H = _bilinear_up2_matrix(Hx, Hs)              # (Hs, Hx)
    U_W = _bilinear_up2_matrix(Wx, Ws)              # (Ws, Wx)

    ihw = params["ih_w"].astype(jnp.float32)
    hhw = params["hh_w"].astype(jnp.float32)

    return dict(
        # 0.25 / 0.75 / 1.0 are exact in bf16, so U_H loses no precision.
        uh=U_H.astype(jnp.bfloat16),
        bandx=_make_band_upsampled(wx, U_W).astype(jnp.bfloat16),
        bandfs=_make_band(wfs, Ws).astype(jnp.bfloat16),
        bias1=jnp.repeat(bn_bias.astype(jnp.float32), Ws)[None, :],
        bihb=_make_band(ihw[:, :, :c2, :], Ws).astype(jnp.bfloat16),
        bihh=_make_band(ihw[:, :, c2:, :], Ws).astype(jnp.bfloat16),
        bhhb=_make_band(hhw[:, :, :c2, :], Ws).astype(jnp.bfloat16),
        bhhr=_make_band(hhw[:, :, c2:, :], Ws).astype(jnp.bfloat16),
        bias_ih=jnp.repeat(params["ih_b"].astype(jnp.float32), Ws)[None, :],
        bias_hh=jnp.repeat(params["hh_b"].astype(jnp.float32), Ws)[None, :],
    )


# ----------------------------------------------------------------------------
# Layout helpers (NCHW <-> channels-major lane merge)
# ----------------------------------------------------------------------------
def _to_cw(t):
    """(B, C, H, W) -> (B, H, C*W)."""
    B, C, H, W = t.shape
    return jnp.transpose(t, (0, 2, 1, 3)).reshape(B, H, C * W)


def _from_cw(t, C):
    """(B, H, C*W) -> (B, C, H, W)."""
    B, H, CW = t.shape
    W = CW // C
    return jnp.transpose(t.reshape(B, H, C, W), (0, 2, 1, 3))


# ----------------------------------------------------------------------------
# Forward pass (PyTorch-style NCHW in / NCHW out, single-frame path)
# ----------------------------------------------------------------------------
def upsampling_block_forward(prepared, x_nchw, f_nchw, s_nchw, r_nchw=None,
                             *, out_channels):
    B = x_nchw.shape[0]
    Hs, Ws = s_nchw.shape[2], s_nchw.shape[3]
    c2 = out_channels // 2

    x2d = _to_cw(x_nchw.astype(jnp.float32)).astype(jnp.bfloat16)
    fs2d = _to_cw(jnp.concatenate([f_nchw, s_nchw], axis=1)
                  .astype(jnp.float32)).astype(jnp.bfloat16)
    if r_nchw is None:
        h2d = jnp.zeros((B, Hs, c2 * Ws), jnp.float32)
    else:
        h2d = _to_cw(r_nchw.astype(jnp.float32))

    out2d = _fused_block_call(x2d, fs2d, h2d, prepared)   # (B, Hs, Cout*Ws) f32
    out_nchw = _from_cw(out2d, out_channels)
    rec_nchw = out_nchw[:, c2:]     # h_new == second half of the output channels
    return out_nchw, rec_nchw


# ----------------------------------------------------------------------------
# Parameters
# ----------------------------------------------------------------------------
def init_params(key, in_channels, skip_channels, src_channels, out_channels):
    cin = in_channels + skip_channels + src_channels
    c2 = out_channels // 2
    ks = jax.random.split(key, 8)
    p = {}
    # self.conv: Conv2d(cin, out, 3, 1, 1, bias=False) + BatchNorm2d + ReLU
    p["conv_w"] = 0.1 * jax.random.normal(ks[0], (3, 3, cin, out_channels), jnp.float32)
    p["bn_gamma"] = 1.0 + 0.1 * jax.random.normal(ks[1], (out_channels,), jnp.float32)
    p["bn_beta"] = 0.1 * jax.random.normal(ks[2], (out_channels,), jnp.float32)
    p["bn_mean"] = 0.1 * jax.random.normal(ks[3], (out_channels,), jnp.float32)
    p["bn_var"] = 1.0 + 0.1 * jnp.abs(jax.random.normal(ks[4], (out_channels,), jnp.float32))
    # gru.ih: Conv2d(2*c2, 2*c2, 3, pad=1) + Sigmoid
    p["ih_w"] = 0.1 * jax.random.normal(ks[5], (3, 3, 2 * c2, 2 * c2), jnp.float32)
    p["ih_b"] = 0.1 * jax.random.normal(ks[6], (2 * c2,), jnp.float32)
    # gru.hh: Conv2d(2*c2, c2, 3, pad=1) + Tanh
    p["hh_w"] = 0.1 * jax.random.normal(ks[7], (3, 3, 2 * c2, c2), jnp.float32)
    p["hh_b"] = jnp.zeros((c2,), jnp.float32)
    return p


# ----------------------------------------------------------------------------
# Pure-JAX reference (original module semantics) for validation
# ----------------------------------------------------------------------------
def _ref_upsample2x_nchw(v):
    def up_axis(t, axis):
        n = t.shape[axis]
        k = jnp.arange(n)
        tp = jnp.take(t, jnp.clip(k - 1, 0, n - 1), axis=axis)
        tn = jnp.take(t, jnp.clip(k + 1, 0, n - 1), axis=axis)
        even = 0.25 * tp + 0.75 * t
        odd = 0.75 * t + 0.25 * tn
        out = jnp.stack([even, odd], axis=axis + 1)
        shp = list(t.shape)
        shp[axis] = 2 * n
        return out.reshape(shp)
    return up_axis(up_axis(v, 2), 3)


def _ref_conv3x3_nchw(x, w_hwio, bias=None):
    out = jax.lax.conv_general_dilated(
        x, w_hwio, window_strides=(1, 1), padding=((1, 1), (1, 1)),
        dimension_numbers=("NCHW", "HWIO", "NCHW"))
    if bias is not None:
        out = out + bias[None, :, None, None]
    return out


def reference_forward(params, x, f, s, r, *, out_channels, bn_eps=1e-5):
    c2 = out_channels // 2
    Hs, Ws = s.shape[2], s.shape[3]
    xu = _ref_upsample2x_nchw(x)[:, :, :Hs, :Ws]
    xc = jnp.concatenate([xu, f, s], axis=1)
    y = _ref_conv3x3_nchw(xc, params["conv_w"])
    scale = params["bn_gamma"] / jnp.sqrt(params["bn_var"] + bn_eps)
    shift = params["bn_beta"] - params["bn_mean"] * scale
    y = jnp.maximum(y * scale[None, :, None, None] + shift[None, :, None, None], 0.0)
    a, b = y[:, :c2], y[:, c2:]
    h = jnp.zeros((x.shape[0], c2, Hs, Ws), jnp.float32) if r is None else r
    rz = jax.nn.sigmoid(_ref_conv3x3_nchw(jnp.concatenate([b, h], 1),
                                          params["ih_w"], params["ih_b"]))
    rg, zg = rz[:, :c2], rz[:, c2:]
    c = jnp.tanh(_ref_conv3x3_nchw(jnp.concatenate([b, rg * h], 1),
                                   params["hh_w"], params["hh_b"]))
    hn = (1.0 - zg) * h + zg * c
    return jnp.concatenate([a, hn], axis=1), hn


# ----------------------------------------------------------------------------
if __name__ == "__main__":
    in_channels, skip_channels, src_channels, out_channels = 8, 4, 3, 8
    B, Hs, Ws = 2, 16, 16
    Hx, Wx = Hs // 2, Ws // 2

    key = jax.random.PRNGKey(0)
    kx, kf, ks_, kr, kp = jax.random.split(key, 5)
    # x spatial is half of s (it is upsampled x2 inside the block), NCHW layout.
    x = jax.random.normal(kx, (B, in_channels, Hx, Wx), jnp.float32)
    f = jax.random.normal(kf, (B, skip_channels, Hs, Ws), jnp.float32)
    s = jax.random.normal(ks_, (B, src_channels, Hs, Ws), jnp.float32)
    r0 = jax.random.normal(kr, (B, out_channels // 2, Hs, Ws), jnp.float32)

    params = init_params(kp, in_channels, skip_channels, src_channels, out_channels)
    # Hoisted weight preparation: banded matrices built once, reused per frame.
    prepared = prepare_block_weights(
        params, Cx=in_channels, Cf=skip_channels, Cs=src_channels,
        Cout=out_channels, Hx=Hx, Wx=Wx, Hs=Hs, Ws=Ws)

    # Pass 1: no recurrent state.  Pass 2: with recurrent state (exercises h path).
    out1, rec1 = upsampling_block_forward(prepared, x, f, s, None,
                                          out_channels=out_channels)
    out2, rec2 = upsampling_block_forward(prepared, x, f, s, r0,
                                          out_channels=out_channels)
    jax.block_until_ready((out1, rec1, out2, rec2))

    assert out1.shape == (B, out_channels, Hs, Ws)
    assert rec1.shape == (B, out_channels // 2, Hs, Ws)
    assert bool(jnp.all(jnp.isfinite(out1))) and bool(jnp.all(jnp.isfinite(rec2)))

    # Validate against the plain-JAX reference of the original module
    # (loose tolerance: kernel uses bf16 matmul inputs with f32 accumulation).
    ref1, rref1 = reference_forward(params, x, f, s, None, out_channels=out_channels)
    ref2, rref2 = reference_forward(params, x, f, s, r0, out_channels=out_channels)
    for got, want in ((out1, ref1), (rec1, rref1), (out2, ref2), (rec2, rref2)):
        err = float(jnp.max(jnp.abs(got - want)))
        assert err < 1e-1, f"max abs err {err}"

    print("KERNEL_OK")
</pallas_src>

<mosaic_0001>
module attributes {stable_mosaic.version = 11 : i64} {
  func.func @_upsampling_block_kernel(%arg0: i32, %arg1: memref<1x8x64xbf16, #tpu.memory_space<vmem>>, %arg2: memref<1x16x112xbf16, #tpu.memory_space<vmem>>, %arg3: memref<1x16x64xf32, #tpu.memory_space<vmem>>, %arg4: memref<16x8xbf16, #tpu.memory_space<vmem>>, %arg5: memref<64x384xbf16, #tpu.memory_space<vmem>>, %arg6: memref<112x384xbf16, #tpu.memory_space<vmem>>, %arg7: memref<1x128xf32, #tpu.memory_space<vmem>>, %arg8: memref<64x384xbf16, #tpu.memory_space<vmem>>, %arg9: memref<64x384xbf16, #tpu.memory_space<vmem>>, %arg10: memref<64x192xbf16, #tpu.memory_space<vmem>>, %arg11: memref<64x192xbf16, #tpu.memory_space<vmem>>, %arg12: memref<1x128xf32, #tpu.memory_space<vmem>>, %arg13: memref<1x64xf32, #tpu.memory_space<vmem>>, %arg14: memref<1x16x128xf32, #tpu.memory_space<vmem>>) attributes {dimension_semantics = [#tpu.dimension_semantics<parallel>], iteration_bounds = array<i64: 2>, scalar_prefetch = 0 : i64, scratch_operands = 0 : i64, tpu.core_type = #tpu.core_type<tc>, window_params = [{transform_indices = @transform_0, window_bounds = array<i64: 1, 8, 64>}, {transform_indices = @transform_1, window_bounds = array<i64: 1, 16, 112>}, {transform_indices = @transform_2, window_bounds = array<i64: 1, 16, 64>}, {pipeline_mode = #tpu.pipeline_mode<synchronous>, transform_indices = @transform_3, window_bounds = array<i64: 16, 8>}, {pipeline_mode = #tpu.pipeline_mode<synchronous>, transform_indices = @transform_4, window_bounds = array<i64: 64, 384>}, {pipeline_mode = #tpu.pipeline_mode<synchronous>, transform_indices = @transform_5, window_bounds = array<i64: 112, 384>}, {pipeline_mode = #tpu.pipeline_mode<synchronous>, transform_indices = @transform_6, window_bounds = array<i64: 1, 128>}, {pipeline_mode = #tpu.pipeline_mode<synchronous>, transform_indices = @transform_7, window_bounds = array<i64: 64, 384>}, {pipeline_mode = #tpu.pipeline_mode<synchronous>, transform_indices = @transform_8, window_bounds = array<i64: 64, 384>}, {pipeline_mode = #tpu.pipeline_mode<synchronous>, transform_indices = @transform_9, window_bounds = array<i64: 64, 192>}, {pipeline_mode = #tpu.pipeline_mode<synchronous>, transform_indices = @transform_10, window_bounds = array<i64: 64, 192>}, {pipeline_mode = #tpu.pipeline_mode<synchronous>, transform_indices = @transform_11, window_bounds = array<i64: 1, 128>}, {pipeline_mode = #tpu.pipeline_mode<synchronous>, transform_indices = @transform_12, window_bounds = array<i64: 1, 64>}, {transform_indices = @transform_13, window_bounds = array<i64: 1, 16, 128>}]} {
    %c0 = arith.constant 0 : index
    %c0_0 = arith.constant 0 : index
    %c0_1 = arith.constant 0 : index
    %0 = vector.load %arg2[%c0, %c0_0, %c0_1] : memref<1x16x112xbf16, #tpu.memory_space<vmem>>, vector<1x16x112xbf16>
    %1 = vector.shape_cast %0 : vector<1x16x112xbf16> to vector<16x112xbf16>
    %c0_2 = arith.constant 0 : index
    %c0_3 = arith.constant 0 : index
    %2 = vector.load %arg6[%c0_2, %c0_3] : memref<112x384xbf16, #tpu.memory_space<vmem>>, vector<112x384xbf16>
    %cst = arith.constant dense<0.000000e+00> : vector<16x384xf32>
    %3 = tpu.matmul %1, %2, %cst {dimension_numbers = #tpu.dot_dimension_numbers<[1], [0], [0], [1], [0, 0, 1, 1], [], []>} : vector<16x112xbf16>, vector<112x384xbf16>, vector<16x384xf32> -> vector<16x384xf32>
    %c0_4 = arith.constant 0 : index
    %c0_5 = arith.constant 0 : index
    %c0_6 = arith.constant 0 : index
    %4 = vector.load %arg1[%c0_4, %c0_5, %c0_6] : memref<1x8x64xbf16, #tpu.memory_space<vmem>>, vector<1x8x64xbf16>
    %5 = vector.shape_cast %4 : vector<1x8x64xbf16> to vector<8x64xbf16>
    %c0_7 = arith.constant 0 : index
    %c0_8 = arith.constant 0 : index
    %6 = vector.load %arg5[%c0_7, %c0_8] : memref<64x384xbf16, #tpu.memory_space<vmem>>, vector<64x384xbf16>
    %cst_9 = arith.constant dense<0.000000e+00> : vector<8x384xf32>
    %7 = tpu.matmul %5, %6, %cst_9 {dimension_numbers = #tpu.dot_dimension_numbers<[1], [0], [0], [1], [0, 0, 1, 1], [], []>} : vector<8x64xbf16>, vector<64x384xbf16>, vector<8x384xf32> -> vector<8x384xf32>
    %c0_10 = arith.constant 0 : index
    %c0_11 = arith.constant 0 : index
    %8 = vector.load %arg4[%c0_10, %c0_11] : memref<16x8xbf16, #tpu.memory_space<vmem>>, vector<16x8xbf16>
    %9 = arith.truncf %7 : vector<8x384xf32> to vector<8x384xbf16>
    %cst_12 = arith.constant dense<0.000000e+00> : vector<16x384xf32>
    %10 = tpu.matmul %8, %9, %cst_12 {dimension_numbers = #tpu.dot_dimension_numbers<[1], [0], [0], [1], [0, 0, 1, 1], [], []>} : vector<16x8xbf16>, vector<8x384xbf16>, vector<16x384xf32> -> vector<16x384xf32>
    %11 = arith.addf %3, %10 : vector<16x384xf32>
    %12 = vector.extract_strided_slice %11 {offsets = [0, 0], sizes = [16, 128], strides = [1, 1]} : vector<16x384xf32> to vector<16x128xf32>
    %13 = tpu.iota {dimensions = array<i32: 0>} : vector<16x128xi32>
    %c0_i32 = arith.constant 0 : i32
    %14 = vector.broadcast %c0_i32 : i32 to vector<16x128xi32>
    %15 = arith.cmpi eq, %13, %14 : vector<16x128xi32>
    %c1_i32 = arith.constant 1 : i32
    %16 = tpu.dynamic_rotate %12 by %c1_i32 dim 0 : vector<16x128xf32>, i32 -> vector<16x128xf32>
    %cst_13 = arith.constant 0.000000e+00 : f32
    %17 = vector.broadcast %cst_13 : f32 to vector<16x128xf32>
    %18 = arith.select %15, %17, %16 : vector<16x128xi1>, vector<16x128xf32>
    %19 = vector.extract_strided_slice %11 {offsets = [0, 128], sizes = [16, 128], strides = [1, 1]} : vector<16x384xf32> to vector<16x128xf32>
    %20 = arith.addf %18, %19 : vector<16x128xf32>
    %21 = vector.extract_strided_slice %11 {offsets = [0, 256], sizes = [16, 128], strides = [1, 1]} : vector<16x384xf32> to vector<16x128xf32>
    %22 = tpu.iota {dimensions = array<i32: 0>} : vector<16x128xi32>
    %c15_i32 = arith.constant 15 : i32
    %23 = vector.broadcast %c15_i32 : i32 to vector<16x128xi32>
    %24 = arith.cmpi eq, %22, %23 : vector<16x128xi32>
    %c15_i32_14 = arith.constant 15 : i32
    %25 = tpu.dynamic_rotate %21 by %c15_i32_14 dim 0 : vector<16x128xf32>, i32 -> vector<16x128xf32>
    %cst_15 = arith.constant 0.000000e+00 : f32
    %26 = vector.broadcast %cst_15 : f32 to vector<16x128xf32>
    %27 = arith.select %24, %26, %25 : vector<16x128xi1>, vector<16x128xf32>
    %28 = arith.addf %20, %27 : vector<16x128xf32>
    %c0_16 = arith.constant 0 : index
    %c0_17 = arith.constant 0 : index
    %29 = vector.load %arg7[%c0_16, %c0_17] : memref<1x128xf32, #tpu.memory_space<vmem>>, vector<1x128xf32>
    %30 = vector.broadcast %29 : vector<1x128xf32> to vector<16x128xf32>
    %31 = arith.addf %28, %30 : vector<16x128xf32>
    %cst_18 = arith.constant 0.000000e+00 : f32
    %32 = vector.broadcast %cst_18 : f32 to vector<16x128xf32>
    %33 = arith.maximumf %31, %32 : vector<16x128xf32>
    %34 = vector.extract_strided_slice %33 {offsets = [0, 0], sizes = [16, 64], strides = [1, 1]} : vector<16x128xf32> to vector<16x64xf32>
    %35 = vector.extract_strided_slice %33 {offsets = [0, 64], sizes = [16, 64], strides = [1, 1]} : vector<16x128xf32> to vector<16x64xf32>
    %36 = arith.truncf %35 : vector<16x64xf32> to vector<16x64xbf16>
    %c0_19 = arith.constant 0 : index
    %c0_20 = arith.constant 0 : index
    %c0_21 = arith.constant 0 : index
    %37 = vector.load %arg3[%c0_19, %c0_20, %c0_21] : memref<1x16x64xf32, #tpu.memory_space<vmem>>, vector<1x16x64xf32>
    %38 = vector.shape_cast %37 : vector<1x16x64xf32> to vector<16x64xf32>
    %39 = arith.truncf %38 : vector<16x64xf32> to vector<16x64xbf16>
    %c0_22 = arith.constant 0 : index
    %c0_23 = arith.constant 0 : index
    %40 = vector.load %arg8[%c0_22, %c0_23] : memref<64x384xbf16, #tpu.memory_space<vmem>>, vector<64x384xbf16>
    %cst_24 = arith.constant dense<0.000000e+00> : vector<16x384xf32>
    %41 = tpu.matmul %36, %40, %cst_24 {dimension_numbers = #tpu.dot_dimension_numbers<[1], [0], [0], [1], [0, 0, 1, 1], [], []>} : vector<16x64xbf16>, vector<64x384xbf16>, vector<16x384xf32> -> vector<16x384xf32>
    %c0_25 = arith.constant 0 : index
    %c0_26 = arith.constant 0 : index
    %42 = vector.load %arg9[%c0_25, %c0_26] : memref<64x384xbf16, #tpu.memory_space<vmem>>, vector<64x384xbf16>
    %cst_27 = arith.constant dense<0.000000e+00> : vector<16x384xf32>
    %43 = tpu.matmul %39, %42, %cst_27 {dimension_numbers = #tpu.dot_dimension_numbers<[1], [0], [0], [1], [0, 0, 1, 1], [], []>} : vector<16x64xbf16>, vector<64x384xbf16>, vector<16x384xf32> -> vector<16x384xf32>
    %44 = arith.addf %41, %43 : vector<16x384xf32>
    %45 = vector.extract_strided_slice %44 {offsets = [0, 0], sizes = [16, 128], strides = [1, 1]} : vector<16x384xf32> to vector<16x128xf32>
    %46 = tpu.iota {dimensions = array<i32: 0>} : vector<16x128xi32>
    %c0_i32_28 = arith.constant 0 : i32
    %47 = vector.broadcast %c0_i32_28 : i32 to vector<16x128xi32>
    %48 = arith.cmpi eq, %46, %47 : vector<16x128xi32>
    %c1_i32_29 = arith.constant 1 : i32
    %49 = tpu.dynamic_rotate %45 by %c1_i32_29 dim 0 : vector<16x128xf32>, i32 -> vector<16x128xf32>
    %cst_30 = arith.constant 0.000000e+00 : f32
    %50 = vector.broadcast %cst_30 : f32 to vector<16x128xf32>
    %51 = arith.select %48, %50, %49 : vector<16x128xi1>, vector<16x128xf32>
    %52 = vector.extract_strided_slice %44 {offsets = [0, 128], sizes = [16, 128], strides = [1, 1]} : vector<16x384xf32> to vector<16x128xf32>
    %53 = arith.addf %51, %52 : vector<16x128xf32>
    %54 = vector.extract_strided_slice %44 {offsets = [0, 256], sizes = [16, 128], strides = [1, 1]} : vector<16x384xf32> to vector<16x128xf32>
    %55 = tpu.iota {dimensions = array<i32: 0>} : vector<16x128xi32>
    %c15_i32_31 = arith.constant 15 : i32
    %56 = vector.broadcast %c15_i32_31 : i32 to vector<16x128xi32>
    %57 = arith.cmpi eq, %55, %56 : vector<16x128xi32>
    %c15_i32_32 = arith.constant 15 : i32
    %58 = tpu.dynamic_rotate %54 by %c15_i32_32 dim 0 : vector<16x128xf32>, i32 -> vector<16x128xf32>
    %cst_33 = arith.constant 0.000000e+00 : f32
    %59 = vector.broadcast %cst_33 : f32 to vector<16x128xf32>
    %60 = arith.select %57, %59, %58 : vector<16x128xi1>, vector<16x128xf32>
    %61 = arith.addf %53, %60 : vector<16x128xf32>
    %c0_34 = arith.constant 0 : index
    %c0_35 = arith.constant 0 : index
    %62 = vector.load %arg12[%c0_34, %c0_35] : memref<1x128xf32, #tpu.memory_space<vmem>>, vector<1x128xf32>
    %63 = vector.broadcast %62 : vector<1x128xf32> to vector<16x128xf32>
    %64 = arith.addf %61, %63 : vector<16x128xf32>
    %65 = arith.negf %64 : vector<16x128xf32>
    %66 = math.exp %65 : vector<16x128xf32>
    %cst_36 = arith.constant 1.000000e+00 : f32
    %67 = vector.broadcast %cst_36 : f32 to vector<16x128xf32>
    %68 = arith.addf %67, %66 : vector<16x128xf32>
    %69 = arith.divf %67, %68 : vector<16x128xf32>
    %70 = vector.extract_strided_slice %69 {offsets = [0, 0], sizes = [16, 64], strides = [1, 1]} : vector<16x128xf32> to vector<16x64xf32>
    %71 = vector.extract_strided_slice %69 {offsets = [0, 64], sizes = [16, 64], strides = [1, 1]} : vector<16x128xf32> to vector<16x64xf32>
    %72 = arith.mulf %70, %38 : vector<16x64xf32>
    %73 = arith.truncf %72 : vector<16x64xf32> to vector<16x64xbf16>
    %c0_37 = arith.constant 0 : index
    %c0_38 = arith.constant 0 : index
    %74 = vector.load %arg10[%c0_37, %c0_38] : memref<64x192xbf16, #tpu.memory_space<vmem>>, vector<64x192xbf16>
    %cst_39 = arith.constant dense<0.000000e+00> : vector<16x192xf32>
    %75 = tpu.matmul %36, %74, %cst_39 {dimension_numbers = #tpu.dot_dimension_numbers<[1], [0], [0], [1], [0, 0, 1, 1], [], []>} : vector<16x64xbf16>, vector<64x192xbf16>, vector<16x192xf32> -> vector<16x192xf32>
    %c0_40 = arith.constant 0 : index
    %c0_41 = arith.constant 0 : index
    %76 = vector.load %arg11[%c0_40, %c0_41] : memref<64x192xbf16, #tpu.memory_space<vmem>>, vector<64x192xbf16>
    %cst_42 = arith.constant dense<0.000000e+00> : vector<16x192xf32>
    %77 = tpu.matmul %73, %76, %cst_42 {dimension_numbers = #tpu.dot_dimension_numbers<[1], [0], [0], [1], [0, 0, 1, 1], [], []>} : vector<16x64xbf16>, vector<64x192xbf16>, vector<16x192xf32> -> vector<16x192xf32>
    %78 = arith.addf %75, %77 : vector<16x192xf32>
    %79 = vector.extract_strided_slice %78 {offsets = [0, 0], sizes = [16, 64], strides = [1, 1]} : vector<16x192xf32> to vector<16x64xf32>
    %80 = tpu.iota {dimensions = array<i32: 0>} : vector<16x64xi32>
    %c0_i32_43 = arith.constant 0 : i32
    %81 = vector.broadcast %c0_i32_43 : i32 to vector<16x64xi32>
    %82 = arith.cmpi eq, %80, %81 : vector<16x64xi32>
    %c1_i32_44 = arith.constant 1 : i32
    %83 = tpu.dynamic_rotate %79 by %c1_i32_44 dim 0 : vector<16x64xf32>, i32 -> vector<16x64xf32>
    %cst_45 = arith.constant 0.000000e+00 : f32
    %84 = vector.broadcast %cst_45 : f32 to vector<16x64xf32>
    %85 = arith.select %82, %84, %83 : vector<16x64xi1>, vector<16x64xf32>
    %86 = vector.extract_strided_slice %78 {offsets = [0, 64], sizes = [16, 64], strides = [1, 1]} : vector<16x192xf32> to vector<16x64xf32>
    %87 = arith.addf %85, %86 : vector<16x64xf32>
    %88 = vector.extract_strided_slice %78 {offsets = [0, 128], sizes = [16, 64], strides = [1, 1]} : vector<16x192xf32> to vector<16x64xf32>
    %89 = tpu.iota {dimensions = array<i32: 0>} : vector<16x64xi32>
    %c15_i32_46 = arith.constant 15 : i32
    %90 = vector.broadcast %c15_i32_46 : i32 to vector<16x64xi32>
    %91 = arith.cmpi eq, %89, %90 : vector<16x64xi32>
    %c15_i32_47 = arith.constant 15 : i32
    %92 = tpu.dynamic_rotate %88 by %c15_i32_47 dim 0 : vector<16x64xf32>, i32 -> vector<16x64xf32>
    %cst_48 = arith.constant 0.000000e+00 : f32
    %93 = vector.broadcast %cst_48 : f32 to vector<16x64xf32>
    %94 = arith.select %91, %93, %92 : vector<16x64xi1>, vector<16x64xf32>
    %95 = arith.addf %87, %94 : vector<16x64xf32>
    %c0_49 = arith.constant 0 : index
    %c0_50 = arith.constant 0 : index
    %96 = vector.load %arg13[%c0_49, %c0_50] : memref<1x64xf32, #tpu.memory_space<vmem>>, vector<1x64xf32>
    %97 = vector.broadcast %96 : vector<1x64xf32> to vector<16x64xf32>
    %98 = arith.addf %95, %97 : vector<16x64xf32>
    %99 = math.tanh %98 : vector<16x64xf32>
    %cst_51 = arith.constant 1.000000e+00 : f32
    %100 = vector.broadcast %cst_51 : f32 to vector<16x64xf32>
    %101 = arith.subf %100, %71 : vector<16x64xf32>
    %102 = arith.mulf %101, %38 : vector<16x64xf32>
    %103 = arith.mulf %71, %99 : vector<16x64xf32>
    %104 = arith.addf %102, %103 : vector<16x64xf32>
    %105 = tpu.concatenate %34, %104 in 1 : vector<16x64xf32>, vector<16x64xf32> -> vector<16x128xf32>
    %c0_52 = arith.constant 0 : index
    %c0_53 = arith.constant 0 : index
    %c0_54 = arith.constant 0 : index
    %106 = vector.load %arg14[%c0_52, %c0_53, %c0_54] : memref<1x16x128xf32, #tpu.memory_space<vmem>>, vector<1x16x128xf32>
    %107 = vector.shape_cast %106 : vector<1x16x128xf32> to vector<16x128xf32>
    %108 = vector.shape_cast %105 : vector<16x128xf32> to vector<1x16x128xf32>
    tpu.vector_store %arg14[%c0_52, %c0_53, %c0_54], %108 {strides = array<i32>} : memref<1x16x128xf32, #tpu.memory_space<vmem>>, vector<1x16x128xf32>,
    return
  }
  func.func @transform_0(%arg0: i32) -> (i32, i32, i32) {
    %c0_i32 = arith.constant 0 : i32
    %c0_i32_0 = arith.constant 0 : i32
    %c0_i32_1 = arith.constant 0 : i32
    return %arg0, %c0_i32, %c0_i32_0 : i32, i32, i32
  }
  func.func @transform_1(%arg0: i32) -> (i32, i32, i32) {
    %c0_i32 = arith.constant 0 : i32
    %c0_i32_0 = arith.constant 0 : i32
    %c0_i32_1 = arith.constant 0 : i32
    return %arg0, %c0_i32, %c0_i32_0 : i32, i32, i32
  }
  func.func @transform_2(%arg0: i32) -> (i32, i32, i32) {
    %c0_i32 = arith.constant 0 : i32
    %c0_i32_0 = arith.constant 0 : i32
    %c0_i32_1 = arith.constant 0 : i32
    return %arg0, %c0_i32, %c0_i32_0 : i32, i32, i32
  }
  func.func @transform_3(%arg0: i32) -> (i32, i32) {
    %c0_i32 = arith.constant 0 : i32
    %c0_i32_0 = arith.constant 0 : i32
    %c0_i32_1 = arith.constant 0 : i32
    return %c0_i32, %c0_i32_0 : i32, i32
  }
  func.func @transform_4(%arg0: i32) -> (i32, i32) {
    %c0_i32 = arith.constant 0 : i32
    %c0_i32_0 = arith.constant 0 : i32
    %c0_i32_1 = arith.constant 0 : i32
    return %c0_i32, %c0_i32_0 : i32, i32
  }
  func.func @transform_5(%arg0: i32) -> (i32, i32) {
    %c0_i32 = arith.constant 0 : i32
    %c0_i32_0 = arith.constant 0 : i32
    %c0_i32_1 = arith.constant 0 : i32
    return %c0_i32, %c0_i32_0 : i32, i32
  }
  func.func @transform_6(%arg0: i32) -> (i32, i32) {
    %c0_i32 = arith.constant 0 : i32
    %c0_i32_0 = arith.constant 0 : i32
    %c0_i32_1 = arith.constant 0 : i32
    return %c0_i32, %c0_i32_0 : i32, i32
  }
  func.func @transform_7(%arg0: i32) -> (i32, i32) {
    %c0_i32 = arith.constant 0 : i32
    %c0_i32_0 = arith.constant 0 : i32
    %c0_i32_1 = arith.constant 0 : i32
    return %c0_i32, %c0_i32_0 : i32, i32
  }
  func.func @transform_8(%arg0: i32) -> (i32, i32) {
    %c0_i32 = arith.constant 0 : i32
    %c0_i32_0 = arith.constant 0 : i32
    %c0_i32_1 = arith.constant 0 : i32
    return %c0_i32, %c0_i32_0 : i32, i32
  }
  func.func @transform_9(%arg0: i32) -> (i32, i32) {
    %c0_i32 = arith.constant 0 : i32
    %c0_i32_0 = arith.constant 0 : i32
    %c0_i32_1 = arith.constant 0 : i32
    return %c0_i32, %c0_i32_0 : i32, i32
  }
  func.func @transform_10(%arg0: i32) -> (i32, i32) {
    %c0_i32 = arith.constant 0 : i32
    %c0_i32_0 = arith.constant 0 : i32
    %c0_i32_1 = arith.constant 0 : i32
    return %c0_i32, %c0_i32_0 : i32, i32
  }
  func.func @transform_11(%arg0: i32) -> (i32, i32) {
    %c0_i32 = arith.constant 0 : i32
    %c0_i32_0 = arith.constant 0 : i32
    %c0_i32_1 = arith.constant 0 : i32
    return %c0_i32, %c0_i32_0 : i32, i32
  }
  func.func @transform_12(%arg0: i32) -> (i32, i32) {
    %c0_i32 = arith.constant 0 : i32
    %c0_i32_0 = arith.constant 0 : i32
    %c0_i32_1 = arith.constant 0 : i32
    return %c0_i32, %c0_i32_0 : i32, i32
  }
  func.func @transform_13(%arg0: i32) -> (i32, i32, i32) {
    %c0_i32 = arith.constant 0 : i32
    %c0_i32_0 = arith.constant 0 : i32
    %c0_i32_1 = arith.constant 0 : i32
    return %arg0, %c0_i32, %c0_i32_0 : i32, i32, i32
  }
}

</mosaic_0001>

<bundles_post_ra>
// kernel: tpu_custom_call.1
= control target key start
LH: loop header
LB: loop body
LE: loop exit
PB: predicated region body
PF: predicated region fallthrough
CT: control target
= control target key end

     0   :  { %s3270_s0 = inlined_call_operand.vmem [shape: bf16[2,8,64], index: 0, kind: input, shape index: {}]   ;;  %s3271_s1 = inlined_call_operand.hbm [shape: bf16[2,16,112], index: 1, kind: input, shape index: {}]   ;;  %s3272_s2 = inlined_call_operand.hbm [shape: f32[2,16,64], index: 2, kind: input, shape index: {}]   ;;  %s3273_s3 = inlined_call_operand.vmem [shape: bf16[16,8], index: 3, kind: input, shape index: {}]   ;;  %s3274_s4 = inlined_call_operand.hbm [shape: bf16[64,384], index: 4, kind: input, shape index: {}]   ;;  %s3275_s5 = inlined_call_operand.hbm [shape: bf16[112,384], index: 5, kind: input, shape index: {}]   ;;  %s3276_s6 = inlined_call_operand.vmem [shape: f32[1,128], index: 6, kind: input, shape index: {}]   ;;  %s3277_s7 = inlined_call_operand.hbm [shape: bf16[64,384], index: 7, kind: input, shape index: {}]   ;;  %s3278_s8 = inlined_call_operand.hbm [shape: bf16[64,384], index: 8, kind: input, shape index: {}]   ;;  %s3279_s9 = inlined_call_operand.hbm [shape: bf16[64,192], index: 9, kind: input, shape index: {}]   ;;  %s3280_s10 = inlined_call_operand.hbm [shape: bf16[64,192], index: 10, kind: input, shape index: {}]   ;;  %s3281_s11 = inlined_call_operand.vmem [shape: f32[1,128], index: 11, kind: input, shape index: {}]   ;;  %s3282_s12 = inlined_call_operand.vmem [shape: f32[1,64], index: 12, kind: input, shape index: {}]   ;;  %s3283_s13 = inlined_call_operand.hbm [shape: f32[2,16,128], index: 13, kind: output, shape index: {}]  }
   0x1   :  { %3293 = sst [smem:[#allocation28_spill]] %s3271_s1 }
   0x2   :  { %3294 = sst [smem:[#allocation29_spill]] %s3274_s4 }
   0x3   :  { %3295 = sst [smem:[#allocation30_spill]] %s3275_s5 }
   0x4   :  { %3296 = sst [smem:[#allocation31_spill]] %s3277_s7 }
   0x5   :  { %3297 = sst [smem:[#allocation32_spill]] %s3278_s8 }
   0x6   :  { %3298 = sst [smem:[#allocation33_spill]] %s3279_s9 }
   0x7   :  { %3299 = sst [smem:[#allocation34_spill]] %s3280_s10 }
   0x8   :  { %18 = vsyncpa [#allocation3], 0 }
   0x9   :  { %20 = vsyncpa [#allocation3 + $0x1], 0 }
   0xa   :  { %21 = vsyncpa [#allocation6], 0 }
   0xb   :  { %23 = vsyncpa [#allocation6 + $0x1], 0 }
   0xc   :  { %24 = vsyncpa [#allocation9], 0 }
   0xd   :  { %25 = vsyncpa [#allocation12], 0 }
   0xe   :  { %26 = vsyncpa [#allocation15], 0 }
   0xf   :  { %27 = vsyncpa [#allocation4], 0 }
  0x10   :  { %29 = vsyncpa [#allocation4 + $0x1], 0  ;;  %s2796_s25 = smov 0   ;;  %s2798_s26 = smov 0  }
  0x11   :  { %s2800_s27 = smov 0   ;;  %s2802_s28 = smov 0  }
  0x12 LB: > { %3300 = sst [smem:[#allocation24_spill]] %s2699_s27  ;;  %s2705_s29 = smov [#allocation7]   ;;  %s2703_s28 = sphi %s2802_s28, %s3335_s28   ;;  %s2699_s27 = sphi %s2800_s27, %s3337_s27   ;;  %s2695_s26 = sphi %s2798_s26, %s3339_s26   ;;  %s2691_s25 = sphi %s2796_s25, %s3338_s25  }
  0x13   : > { %s369_s30 = sshll.u32 %s2705_s29, 4  ;;  %s2817_s14 = sadd.s32 4294967295, %s2703_s28   ;;  %s370_s30 = int_to_ptr.vmem [resolvable:$true] %s369_s30 }
  0x14   : > { %p1958_p0 = scmp.ge.s32.totalorder %s2703_s28, 1  ;;  %p3286_p1 = scmp.eq.s32.totalorder %s2817_s14, 0 }
  0x15   : > { %p354_p2 = scmp.lt.s32.totalorder %s2703_s28, 3  ;;  %s2706_s16 = smov [#allocation8]  }
  0x16   : > { %s382_s17 = sshll.u32 %s2706_s16, 4  ;;  %s2707_s19 = smov [#allocation11]   ;;  %s2835_s17 = int_to_ptr.vmem [resolvable:$true] %s382_s17 }
  0x17   : > { %p2822_p3 = pnand %p1958_p0, %p354_p2  ;;  %s411_s20 = sshll.u32 %s2707_s19, 4  ;;  %s2837_s20 = int_to_ptr.vmem [resolvable:$true] %s411_s20 }
  0x18   : > { %s2418_s22 = scalar_lea.vmem %s370_s30, 1536  ;;  %p2426_p11 = scmp.lt.s32.totalorder %s370_s30, %s370_s30 }
  0x19   : > { %p2199_p5 = pneg %p2822_p3  ;;  %p2419_p8 = scmp.ne.s32.totalorder %s370_s30, %s2418_s22 }
  0x1a   : > { %p2427_p12 = scmp.lt.s32.totalorder %s2418_s22, %s2418_s22 }
  0x1b   : > { %p2831_p6 = pnand %p2199_p5, %p3286_p1 }
  0x1c   : > { %p2428_p13 = por %p2427_p12, %p2426_p11 }
  0x1d   : > { %p2841_p7 = pneg %p2831_p6 }
  0x1f   : > { %p2421_p9 = pnand %p2419_p8, %p2841_p7 }
  0x21   : > { %p2422_p10 = pneg %p2421_p9 }
  0x23   : > { %p2429_p0 = pnand %p2428_p13, %p2422_p10 }
  0x25   : > { %2432 = shalt.err (!%p2429_p0)
}
  0x26   : > { %s2708_s23 = smov 192   ;;  %s2709_s24 = smov 12  }
  0x27   : > { %s3304_s4 = sld [smem:[#allocation29_spill]]  ;;  %s2444_s19 = scalar_lea.vmem %s2835_s17, 2688 }
  0x28   : > { %p2445_p2 = scmp.ne.s32.totalorder %s2835_s17, %s2444_s19  ;;  %p2452_p9 = scmp.lt.s32.totalorder %s2835_s17, %s2835_s17 }
  0x29   : > { %p2453_p10 = scmp.lt.s32.totalorder %s2444_s19, %s2444_s19 }
  0x2a   : > { %p2447_p5 = pnand %p2445_p2, %p2841_p7 }
  0x2b   : > { %p2454_p11 = por %p2453_p10, %p2452_p9 }
  0x2c   : > { %p2448_p8 = pneg %p2447_p5 }
  0x2d   : > { %2202 = dma.hbm_to_vmem [thread:$0]  (!%p2831_p6), %s3304_s4, 1536, %s370_s30, [#allocation6], %s2708_s23, %s2708_s23, %s2709_s24  }
  0x2e   : > { %p2455_p12 = pnand %p2454_p11, %p2448_p8 }
  0x30   : > { %2458 = shalt.err (!%p2455_p12)
}
  0x31   : > { %s3305_s5 = sld [smem:[#allocation30_spill]]  ;;  %s2470_s30 = scalar_lea.vmem %s2837_s20, 1536 }
  0x32   : > { %p2471_p13 = scmp.ne.s32.totalorder %s2837_s20, %s2470_s30  ;;  %p2478_p5 = scmp.lt.s32.totalorder %s2837_s20, %s2837_s20 }
  0x33   : > { %p2479_p8 = scmp.lt.s32.totalorder %s2470_s30, %s2470_s30 }
  0x34   : > { %p2473_p0 = pnand %p2471_p13, %p2841_p7 }
  0x35   : > { %p2480_p9 = por %p2479_p8, %p2478_p5 }
  0x36   : > { %p2474_p2 = pneg %p2473_p0 }
  0x37   : > { %2205 = dma.hbm_to_vmem [thread:$0]  (!%p2831_p6), %s3305_s5, 2688, %s2835_s17, [#allocation9], %s2708_s23, %s2708_s23, %s2709_s24  }
  0x38   : > { %p2481_p10 = pnand %p2480_p9, %p2474_p2 }
  0x3a   : > { %2484 = shalt.err (!%p2481_p10)
}
  0x3b   : > { %s3306_s8 = sld [smem:[#allocation32_spill]]  ;;  %s2710_s17 = smov [#allocation10]  }
  0x3c   : > { %s398_s22 = sshll.u32 %s2710_s17, 4  ;;  %s2711_s29 = smov [#allocation13]   ;;  %s399_s22 = int_to_ptr.vmem [resolvable:$true] %s398_s22 }
  0x3d   : > { %s424_s4 = sshll.u32 %s2711_s29, 4  ;;  %s2496_s30 = scalar_lea.vmem %s399_s22, 1536  ;;  %s425_s4 = int_to_ptr.vmem [resolvable:$true] %s424_s4 }
  0x3e   : > { %p2497_p11 = scmp.ne.s32.totalorder %s399_s22, %s2496_s30  ;;  %p2504_p0 = scmp.lt.s32.totalorder %s399_s22, %s399_s22 }
  0x3f   : > { %p2505_p2 = scmp.lt.s32.totalorder %s2496_s30, %s2496_s30 }
  0x40   : > { %p2499_p12 = pnand %p2497_p11, %p2841_p7 }
  0x41   : > { %2211 = dma.hbm_to_vmem [thread:$0]  (!%p2831_p6), %s3306_s8, 1536, %s2837_s20, [#allocation12], %s2708_s23, %s2708_s23, %s2709_s24  }
  0x42   : > { %p2500_p13 = pneg %p2499_p12  ;;  %p2506_p5 = por %p2505_p2, %p2504_p0 }
  0x44   : > { %p2507_p8 = pnand %p2506_p5, %p2500_p13 }
  0x46   : > { %2510 = shalt.err (!%p2507_p8)
}
  0x47   : > { %s3307_s7 = sld [smem:[#allocation31_spill]]  ;;  %s2522_s19 = scalar_lea.vmem %s425_s4, 1024 }
  0x48   : > { %p2523_p9 = scmp.ne.s32.totalorder %s425_s4, %s2522_s19  ;;  %p2530_p12 = scmp.lt.s32.totalorder %s425_s4, %s425_s4 }
  0x49   : > { %p2531_p0 = scmp.lt.s32.totalorder %s2522_s19, %s2522_s19 }
  0x4a   : > { %p2525_p10 = pnand %p2523_p9, %p2841_p7 }
  0x4b   : > { %p2532_p13 = por %p2531_p0, %p2530_p12 }
  0x4c   : > { %p2526_p11 = pneg %p2525_p10 }
  0x4d   : > { %2208 = dma.hbm_to_vmem [thread:$0]  (!%p2831_p6), %s3307_s7, 1536, %s399_s22, [#allocation9], %s2708_s23, %s2708_s23, %s2709_s24  }
  0x4e   : > { %p2533_p2 = pnand %p2532_p13, %p2526_p11 }
  0x50   : > { %2536 = shalt.err (!%p2533_p2)
}
  0x51   : > { %s3284_s17 = smov 128   ;;  %s3285_s29 = smov 8  }
  0x52   : > { %s3308_s9 = sld [smem:[#allocation33_spill]]  ;;  %s2714_s22 = smov [#allocation14]  }
  0x53   : > { %s437_s30 = sshll.u32 %s2714_s22, 4  ;;  %s438_s30 = int_to_ptr.vmem [resolvable:$true] %s437_s30 }
  0x54   : > { %s2548_s20 = scalar_lea.vmem %s438_s30, 1024  ;;  %p2556_p10 = scmp.lt.s32.totalorder %s438_s30, %s438_s30 }
  0x55   : > { %p2549_p5 = scmp.ne.s32.totalorder %s438_s30, %s2548_s20  ;;  %p2557_p11 = scmp.lt.s32.totalorder %s2548_s20, %s2548_s20 }
  0x57   : > { %p2551_p8 = pnand %p2549_p5, %p2841_p7  ;;  %p2558_p12 = por %p2557_p11, %p2556_p10 }
  0x58   : > { %2214 = dma.hbm_to_vmem [thread:$0]  (!%p2831_p6), %s3308_s9, 1024, %s425_s4, [#allocation12], %s3284_s17, %s3284_s17, %s3285_s29  }
  0x59   : > { %p2552_p9 = pneg %p2551_p8 }
  0x5b   : > { %p2559_p0 = pnand %p2558_p12, %p2552_p9 }
  0x5d   : > { %2562 = shalt.err (!%p2559_p0)
}
  0x5e   : > { %s3309_s10 = sld [smem:[#allocation34_spill]]  ;;  %s1957_s18 = sadd.s32 4294967294, %s2703_s28  }
  0x5f   : > { %s2917_s21 = sadd.s32 1, %s2703_s28   ;;  %s68_s23 = sadd.s32 1, %s2699_s27 }
  0x60   : > { %3310 = sst [smem:[#allocation25_spill]] %s2917_s21  ;;  %s65_s19 = ssub.s32 %s2703_s28, %s2917_s21 }
  0x61   : > { %p66_p7 = scmp.eq.s32.totalorder %s65_s19, 0  ;;  %p75_p13 = scmp.ne.s32.totalorder %s2699_s27, %s2695_s26 }
  0x62   : > { %p76_p2 = scmp.eq.s32.totalorder %s2703_s28, 0  ;;  %p81_p5 = scmp.ne.s32.totalorder %s2695_s26, %s2691_s25 }
  0x63   : > { %s2928_s24 = scalar_select %p66_p7, %s2699_s27, %s68_s23  }
  0x64   : > { %2217 = dma.hbm_to_vmem [thread:$0]  (!%p2831_p6), %s3309_s10, 1024, %s438_s30, [#allocation15], %s3284_s17, %s3284_s17, %s3285_s29  }
  0x65   : > { %3311 = sst [smem:[#allocation26_spill]] %s2928_s24  ;;  %p2930_p8 = por %p76_p2, %p75_p13 }
  0x66   : > { %p2936_p6 = por %p3286_p1, %p81_p5  ;;  %p341_p9 = scmp.eq.s32.totalorder %s2817_s14, 1 }
  0x67   : > { %p347_p10 = scmp.eq.s32.totalorder %s1957_s18, 1  ;;  %p2235_p11 = scmp.lt.s32.totalorder %s2703_s28, 2 }
  0x68   : > { %s3313_s30 = scalar_select %p2936_p6, 1, 0 }
  0x69   : > { %s2943_s20 = sand.u32 1, %s2699_s27   ;;  %p2945_p12 = por %p341_p9, %p75_p13 }
  0x6a   : > { %p2949_p0 = por %p347_p10, %p81_p5  ;;  %s1966_s19 = sshll.u32 %s2943_s20, 3 }
  0x6b   : > { %s3314_s16 = scalar_select %p2945_p12, 1, 0 }
  0x6c   : > { %s3315_s4 = scalar_select %p2949_p0, 1, 0 }
  0x6d   : > { %s2081_s23 = sshll.u32 %s2703_s28, 7  ;;  %s3317_s1 = sld [smem:[#allocation28_spill]] }
  0x6e   : > { %3316 = sst [smem:[#allocation27_spill]] %s3315_s4  ;;  %s468_s18 = scalar_lea.vmem [#allocation2], %s1966_s19 }
  0x6f   : > { %s475_s7 = sshll.u32 %s468_s18, 4  ;;  %p2964_p7 = pnand %p2235_p11, %p2930_p8  ;;  %s2960_s7 = int_to_ptr.vmem [resolvable:$true] %s475_s7 }
  0x70   : > { %s465_s10 = scalar_lea.sflag [#allocation3], %s2943_s20 }
  0x71   : > { %p2565_p2 = pneg %p2964_p7 }
  0x73   : > { %s2958_s5 = scalar_lea.hbm %s3317_s1, %s2081_s23  ;;  %s2568_s22 = scalar_lea.hbm %s3317_s1, 256 }
  0x74   : > { %s2563_s24 = scalar_lea.hbm %s2958_s5, 128  ;;  %p2569_p8 = scmp.lt.s32.totalorder %s2958_s5, %s3317_s1 }
  0x75   : > { %p2564_p13 = scmp.ne.s32.totalorder %s2958_s5, %s2563_s24  ;;  %p2570_p10 = scmp.lt.s32.totalorder %s2568_s22, %s2563_s24 }
  0x77   : > { %p2566_p5 = pnand %p2565_p2, %p2564_p13  ;;  %p2571_p11 = por %p2570_p10, %p2569_p8 }
  0x79   : > { %p2567_p9 = pneg %p2566_p5 }
  0x7b   : > { %p2572_p4 = pnand %p2571_p11, %p2567_p9 }
  0x7d   : > { %2575 = shalt.err (!%p2572_p4)
}
  0x7e   : > { %s2576_s18 = scalar_lea.vmem %s2960_s7, 128  ;;  %s2715_s17 = smov [#allocation2]  }
  0x7f   : > { %p2577_p1 = scmp.ne.s32.totalorder %s2960_s7, %s2576_s18  ;;  %s2581_s29 = sshll.u32 %s2715_s17, 4  ;;  %s2582_s29 = int_to_ptr.vmem [resolvable:$false] %s2581_s29 }
  0x80   : > { %s2583_s9 = scalar_lea.vmem %s2582_s29, 256  ;;  %p2584_p0 = scmp.lt.s32.totalorder %s2960_s7, %s2582_s29 }
  0x81   : > { %p2579_p13 = pnand %p2577_p1, %p2565_p2  ;;  %p2585_p12 = scmp.lt.s32.totalorder %s2583_s9, %s2576_s18 }
  0x83   : > { %p2580_p5 = pneg %p2579_p13  ;;  %p2586_p6 = por %p2585_p12, %p2584_p0 }
  0x85   : > { %p2587_p8 = pnand %p2586_p6, %p2580_p5 }
  0x87   : > { %2590 = shalt.err (!%p2587_p8)
}
  0x88   : > { %s2716_s24 = smov 64   ;;  %s2717_s22 = smov 4  }
  0x89   : > { %2221 = dma.hbm_to_vmem [thread:$0]  (!%p2964_p7), %s2958_s5, 128, %s2960_s7, %s465_s10, %s2716_s24, %s2716_s24, %s2717_s22  }
  0x8a   : > { %s1969_s19 = sshll.u32 %s2943_s20, 4  ;;  %s2082_s23 = sshll.u32 %s2703_s28, 8 }
  0x8b   : > { %s3001_s18 = scalar_lea.hbm %s3272_s2, %s2082_s23  ;;  %s489_s29 = scalar_lea.vmem [#allocation5], %s1969_s19 }
  0x8c   : > { %s496_s1 = sshll.u32 %s489_s29, 4  ;;  %s3319_s27 = sand.u32 1, %s2703_s28   ;;  %s3003_s1 = int_to_ptr.vmem [resolvable:$true] %s496_s1 }
  0x8d   : > { %s486_s21 = scalar_lea.sflag [#allocation6], %s3319_s27  ;;  %s2591_s4 = scalar_lea.hbm %s3001_s18, 256 }
  0x8e   : > { %p2592_p1 = scmp.ne.s32.totalorder %s3001_s18, %s2591_s4  ;;  %s2596_s10 = scalar_lea.hbm %s3272_s2, 512 }
  0x8f   : > { %p2597_p12 = scmp.lt.s32.totalorder %s3001_s18, %s3272_s2  ;;  %p2598_p0 = scmp.lt.s32.totalorder %s2596_s10, %s2591_s4 }
  0x90   : > { %p2594_p4 = pnand %p2592_p1, %p2565_p2 }
  0x91   : > { %p2599_p9 = por %p2598_p0, %p2597_p12 }
  0x92   : > { %p2595_p6 = pneg %p2594_p4 }
  0x94   : > { %p2600_p10 = pnand %p2599_p9, %p2595_p6 }
  0x96   : > { %2603 = shalt.err (!%p2600_p10)
}
  0x97   : > { %s2604_s27 = scalar_lea.vmem %s3003_s1, 256  ;;  %s2718_s22 = smov [#allocation5]  }
  0x98   : > { %p2605_p11 = scmp.ne.s32.totalorder %s3003_s1, %s2604_s27  ;;  %s2609_s19 = sshll.u32 %s2718_s22, 4  ;;  %s2610_s19 = int_to_ptr.vmem [resolvable:$false] %s2609_s19 }
  0x99   : > { %s2611_s23 = scalar_lea.vmem %s2610_s19, 512  ;;  %p2612_p8 = scmp.lt.s32.totalorder %s3003_s1, %s2610_s19 }
  0x9a   : > { %p2607_p13 = pnand %p2605_p11, %p2565_p2  ;;  %p2613_p1 = scmp.lt.s32.totalorder %s2611_s23, %s2604_s27 }
  0x9c   : > { %p2608_p5 = pneg %p2607_p13  ;;  %p2614_p4 = por %p2613_p1, %p2612_p8 }
  0x9e   : > { %p2615_p12 = pnand %p2614_p4, %p2608_p5 }
  0xa0   : > { %2618 = shalt.err (!%p2615_p12)
}
  0xa1   : > { %s3320_s4 = smov 8   ;;  %s3321_s17 = smov 128  }
  0xa2   : > { %2224 = dma.hbm_to_vmem [thread:$0]  (!%p2964_p7), %s3001_s18, 256, %s3003_s1, %s486_s21, %s3321_s17, %s3321_s17, %s3320_s4  }
  0xa3   : > { %508 = sbr.rel (%p2822_p3) target bundleno = 1473 (0x5c1), region = 72  ;;  %s3035_s9 = sand.u32 (!%p2822_p3), 1, %s2695_s26  }
  0xa4   : > { %s1973_s29 = sshll.u32 (!%p2822_p3), %s3035_s9, 3  ;;  %s511_s5 = scalar_lea.sflag (!%p2822_p3), [#allocation3], %s3035_s9 }
  0xa5   : > { %s3039_s7 = scalar_lea.vmem (!%p2822_p3), [#allocation2], %s1973_s29  ;;  %p3322_p2 = scmp.ne.s32.totalorder (!%p2822_p3), %s3313_s30, 0 }
  0xa8   : > { %2662 = dma.done.wait (%p3322_p2), %s511_s5, 128  }
  0xa9   : > { %2664 = vsyncadd (%p3322_p2), %s511_s5, 4294967168  ;;  %s519_s1 = sand.u32 1, %s2817_s14   ;;  %s1974_s8 = sshll.u32 %s3035_s9, 4 }
  0xaa   : > { %s520_s15 = scalar_lea.sflag [#allocation6], %s519_s1  ;;  %s3049_s21 = scalar_lea.vmem [#allocation5], %s1974_s8 }
  0xab   : > { %2666 = dma.done.wait (%p3322_p2), %s520_s15, 256  }
  0xac   : > { %2668 = vsyncadd (%p3322_p2), %s520_s15, 4294967040  ;;  %p3323_p3 = scmp.eq.s32.totalorder %s2817_s14, 0 }
  0xae   : > { %2670 = dma.done.wait (%p3323_p3), [#allocation6], 1536   ;;  %p3324_p7 = pmov %p3323_p3 }
  0xaf   : > { %p3325_p6 = pmov %p3323_p3 }
  0xb0   : > { %2672 = vsyncadd (%p3324_p7), [#allocation6], 4294965760 }
  0xb1   : > { %2674 = dma.done.wait (%p3325_p6), [#allocation9], 4224   ;;  %p3326_p0 = pmov %p3323_p3 }
  0xb3   : > { %2676 = vsyncadd (%p3326_p0), [#allocation9], 4294963072  ;;  %p3327_p9 = pmov %p3326_p0 }
  0xb4   : > { %p3328_p10 = pmov %p3326_p0 }
  0xb5   : > { %2678 = dma.done.wait (%p3327_p9), [#allocation12], 2560  }
  0xb6   : > { %2680 = vsyncadd (%p3328_p10), [#allocation12], 4294964736  ;;  %p3329_p11 = pmov %p3326_p0 }
  0xb7   : > { %p3330_p13 = pmov %p3326_p0 }
  0xb8   : > { %2682 = dma.done.wait (%p3329_p11), [#allocation15], 1024  }
  0xb9   : > { %2684 = vsyncadd (%p3330_p13), [#allocation15], 4294966272  ;;  %v2719_v0 = vmov 0.0   ;;  %vm2720_vm0 = vmmov 0   ;;  %v2721_v1 = vmov 0   ;;  %p599_p5 = scmp.lt.s32.totalorder %s2817_s14, 1 }
  0xba   : > { %2109 = vmatprep.subr.bf16.mxu1 %v2719_v0  ;;  %2117 = vmatprep.mubr.msk.bf16.mxu1 %vm2720_vm0, %v2719_v0  ;;  %v2293_v2 = vld [vmem:[#allocation7 + $0x4c] ss:$12 sps:$4 sm:$0xff]   ;;  %v2295_v3 = vld [vmem:[#allocation7 + $0x50] ss:$12 sps:$4 sm:$0xff]   ;;  %v2296_v4 = vld [vmem:[#allocation7 + $0x48] ss:$12 sps:$4 sm:$0xff]  }
  0xbb   : > { %751 = vmatprep.mubr.bf16.mxu0 %v2721_v1  ;;  %727 = vmatprep.subr.bf16.mxu0 %v2293_v2  ;;  %s600_s30 = scalar_select %p599_p5, %s2817_s14, 1  ;;  %v2297_v5 = vld [vmem:[#allocation7 + $0x34] ss:$12 sps:$4 sm:$0xff]   ;;  %v2299_v6 = vld [vmem:[#allocation7 + $0x38] ss:$12 sps:$4 sm:$0xff]   ;;  %vm715_vm1 = vcmask 523264  }
  0xbc   : > { %2110 = vmatpush3.bf16.msra.mxu1 %v2295_v3  ;;  %728 = vmatpush1.bf16.msra.mxu0 %v2296_v4  ;;  %v2300_v7 = vld [vmem:[#allocation7 + $0x30] ss:$12 sps:$4 sm:$0xff]   ;;  %v2303_v9 = vld [vmem:[#allocation7 + $0x20] ss:$12 sps:$4 sm:$0xff]   ;;  %v2304_v10 = vld [vmem:[#allocation7 + $0x18] ss:$12 sps:$4 sm:$0xff]  }
  0xbd   : > { %2111 = vmatprep.subr.bf16.mxu1 %v2719_v0  ;;  %729 = vmatprep.subr.bf16.mxu0 %v2297_v5  ;;  %v2301_v8 = vld [vmem:[#allocation7 + $0x1c] ss:$12 sps:$4 sm:$0xff]   ;;  %s1982_s18 = sshll.u32 %s600_s30, 2  ;;  %v2305_v11 = vld [vmem:[#allocation7 + $0x4] ss:$12 sps:$4 sm:$0xff]   ;;  %vm814_vm2 = vcmask 1043456  }
  0xbe   : > { %v2307_v12 = vld [vmem:[#allocation7 + $0x8] ss:$12 sps:$4 sm:$0xff]   ;;  %v2308_v13 = vld [vmem:[#allocation7] ss:$12 sps:$4 sm:$0xff]   ;;  %s602_s24 = scalar_lea.vmem %s3270_s0, %s1982_s18  ;;  %vm810_vm3 = vcmask 64512   ;;  %vm1025_vm4 = vcmask 916480  }
  0xbf   : > { %v634_v14 = vld [vmem:[%s602_s24] sm:$0xf]  ;;  %v2310_v25 = vld [vmem:[#allocation8 + $0x98] ss:$12 sps:$4 sm:$0xff]   ;;  %v2313_v26 = vld [vmem:[#allocation8 + $0x94] ss:$12 sps:$4 sm:$0xff]  }
  0xc0   : > { %2112 = vmatpush3.bf16.msra.mxu1 %v2299_v6  ;;  %730 = vmatpush1.bf16.msra.mxu0 %v2300_v7  ;;  %v2309_v22 = vld [vmem:[%s3273_s3] sm:$0xff]   ;;  %v2314_v32 = vld [vmem:[#allocation8 + $0x80] ss:$12 sps:$4 sm:$0xff]   ;;  %v2317_v33 = vld [vmem:[#allocation8 + $0x7c] ss:$12 sps:$4 sm:$0xff]   ;;  %s2722_s4 = smov 64  }
  0xc1   : > { %2113 = vmatprep.subr.bf16.mxu1 %v2719_v0  ;;  %731 = vmatprep.subr.bf16.mxu0 %v2301_v8  ;;  %v2311_v31 = vld [vmem:[#allocation8 + $0x90] ss:$12 sps:$4 sm:$0xff]   ;;  %v2315_v34 = vld [vmem:[#allocation8 + $0x78] ss:$12 sps:$4 sm:$0xff]   ;;  %v2318_v35 = vld [vmem:[#allocation8 + $0x68] ss:$12 sps:$4 sm:$0xff]  }
  0xc2   : > { %v2321_v36 = vld [vmem:[#allocation8 + $0x64] ss:$12 sps:$4 sm:$0xff]   ;;  %v2319_v37 = vld [vmem:[#allocation8 + $0x60] ss:$12 sps:$4 sm:$0xff]   ;;  %v2323_v40 = vld [vmem:[#allocation8 + $0x48] ss:$12 sps:$4 sm:$0xff]  }
  0xc3   : > { %v2322_v38 = vld [vmem:[#allocation8 + $0x50] ss:$12 sps:$4 sm:$0xff]   ;;  %v2325_v39 = vld [vmem:[#allocation8 + $0x4c] ss:$12 sps:$4 sm:$0xff]   ;;  %v2329_v42 = vld [vmem:[#allocation8 + $0x34] ss:$12 sps:$4 sm:$0xff]  }
  0xc4   : > { %2114 = vmatpush3.bf16.msra.mxu1 %v2303_v9  ;;  %732 = vmatpush1.bf16.msra.mxu0 %v2304_v10  ;;  %v2326_v41 = vld [vmem:[#allocation8 + $0x38] ss:$12 sps:$4 sm:$0xff]   ;;  %v2327_v43 = vld [vmem:[#allocation8 + $0x30] ss:$12 sps:$4 sm:$0xff]   ;;  %v2330_v44 = vld [vmem:[#allocation8 + $0x20] ss:$12 sps:$4 sm:$0xff]  }
  0xc5   : > { %2115 = vmatprep.subr.bf16.mxu1 %v2719_v0  ;;  %733 = vmatprep.subr.bf16.mxu0 %v2305_v11  ;;  %v2333_v45 = vld [vmem:[#allocation8 + $0x1c] ss:$12 sps:$4 sm:$0xff]   ;;  %v2331_v46 = vld [vmem:[#allocation8 + $0x18] ss:$12 sps:$4 sm:$0xff]   ;;  %v2335_v49 = vld [vmem:[#allocation8] ss:$12 sps:$4 sm:$0xff]  }
  0xc6   : > { %v2334_v47 = vld [vmem:[#allocation8 + $0x8] ss:$12 sps:$4 sm:$0xff]   ;;  %v2337_v48 = vld [vmem:[#allocation8 + $0x4] ss:$12 sps:$4 sm:$0xff]   ;;  %v2346_v55 = vld [vmem:[#allocation11 + $0x38] ss:$12 sps:$4 sm:$0xff]  }
  0xc7   : > { %v2338_v50 = vld [vmem:[%s3039_s7] sm:$0xff]   ;;  %v2347_v59 = vld [vmem:[#allocation11 + $0x18] ss:$12 sps:$4 sm:$0xff]   ;;  %s598_s1 = scalar_lea.vmem [#allocation16], %s1974_s8  ;;  %p3331_p1 = scmp.ne.s32.totalorder %s3314_s16, 0 }
  0xc8   : > { %2116 = vmatpush3.bf16.msra.mxu1 %v2307_v12  ;;  %734 = vmatpush1.bf16.msra.mxu0 %v2308_v13  ;;  %v2339_v51 = vld [vmem:[#allocation11 + $0x48] ss:$12 sps:$4 sm:$0xff]   ;;  %v2341_v52 = vld [vmem:[#allocation11 + $0x4c] ss:$12 sps:$4 sm:$0xff]   ;;  %v2342_v53 = vld [vmem:[#allocation11 + $0x50] ss:$12 sps:$4 sm:$0xff]  }
  0xc9   : > { %2121 = vmatprep.subr.bf16.mxu1 %v2719_v0  ;;  %v2345_v54 = vld [vmem:[#allocation11 + $0x34] ss:$12 sps:$4 sm:$0xff]   ;;  %v2343_v56 = vld [vmem:[#allocation11 + $0x30] ss:$12 sps:$4 sm:$0xff]   ;;  %v2357_v3 = vld [vmem:[#allocation10 + $0x4c] ss:$12 sps:$4 sm:$0xff]  }
  0xca   : > { %v2349_v57 = vld [vmem:[#allocation11 + $0x1c] ss:$12 sps:$4 sm:$0xff]   ;;  %v2350_v58 = vld [vmem:[#allocation11 + $0x20] ss:$12 sps:$4 sm:$0xff]   ;;  %v2353_v60 = vld [vmem:[#allocation11 + $0x4] ss:$12 sps:$4 sm:$0xff]  }
  0xcb   : > { %2118 = vmatmul.mubr.msk.bf16.vlgmr.msra.gmra.mxu1 %vm715_vm1, %v634_v14  ;;  %1995 = vmatmul.mubr.msk.bf16.vlgmr.msra.gmra.mxu0 %vm715_vm1, %v634_v14  ;;  %v2354_v61 = vld [vmem:[#allocation11 + $0x8] ss:$12 sps:$4 sm:$0xff]   ;;  %v2351_v62 = vld [vmem:[#allocation11] ss:$12 sps:$4 sm:$0xff]   ;;  %v2358_v5 = vld [vmem:[#allocation10 + $0x50] ss:$12 sps:$4 sm:$0xff]  }
  0xcc   : > { %2123 = vmatprep.mubr.msk.bf16.mxu1 %vm2720_vm0, %v2719_v0  ;;  %856 = vmatprep.mubr.bf16.mxu0 %v2721_v1  ;;  %v3116_v63 = vld [vmem:[%s3049_s21] sm:$0xff]  ;;  %v3119_v2 = vld [vmem:[%s3049_s21 + $0x8] sm:$0xff]  ;;  %s1792_s15 = sshll.u32 %s598_s1, 4  ;;  %s2083_s21 = sshll.u32 %s2817_s14, 8  ;;  %s3219_s15 = int_to_ptr.vmem [resolvable:$true] %s1792_s15 }
  0xcd   : > { %v1152_v4 = vpack.c.bf16 %v3119_v2, %v3116_v63  ;;  %v2355_v6 = vld [vmem:[#allocation10 + $0x48] ss:$12 sps:$4 sm:$0xff]   ;;  %v2362_v8 = vld [vmem:[#allocation10 + $0x38] ss:$12 sps:$4 sm:$0xff]   ;;  %v2359_v9 = vld [vmem:[#allocation10 + $0x30] ss:$12 sps:$4 sm:$0xff]   ;;  %s3224_s18 = scalar_lea.hbm %s3283_s13, %s2083_s21 }
  0xce   : > { %v2361_v7 = vld [vmem:[#allocation10 + $0x34] ss:$12 sps:$4 sm:$0xff]   ;;  %v2365_v10 = vld [vmem:[#allocation10 + $0x1c] ss:$12 sps:$4 sm:$0xff]   ;;  %v2363_v12 = vld [vmem:[#allocation10 + $0x18] ss:$12 sps:$4 sm:$0xff]  }
  0xcf   : > { %v2366_v11 = vld [vmem:[#allocation10 + $0x20] ss:$12 sps:$4 sm:$0xff]   ;;  %v2369_v13 = vld [vmem:[#allocation10 + $0x4] ss:$12 sps:$4 sm:$0xff]   ;;  %v2370_v14 = vld [vmem:[#allocation10 + $0x8] ss:$12 sps:$4 sm:$0xff]  }
  0xd0   : > { %s1779_s14 = scalar_lea.sflag [#allocation4], %s3035_s9  ;;  %s2619_s10 = scalar_lea.vmem %s3219_s15, 256 }
  0xd1   : > { %p2620_p8 = scmp.ne.s32.totalorder %s3219_s15, %s2619_s10  ;;  %s2723_s20 = smov [#allocation16]  }
  0xd2   : > { %s2623_s24 = sshll.u32 %s2723_s20, 4  ;;  %s2624_s24 = int_to_ptr.vmem [resolvable:$false] %s2623_s24 }
  0xd3   : > { %p2621_p4 = pnand %p2620_p8, %p3331_p1  ;;  %s2625_s27 = scalar_lea.vmem %s2624_s24, 512 }
  0xd4   : > { %p2626_p2 = scmp.lt.s32.totalorder %s3219_s15, %s2624_s24  ;;  %p2627_p3 = scmp.lt.s32.totalorder %s2625_s27, %s2619_s10 }
  0xd5   : > { %p2622_p12 = pneg %p2621_p4 }
  0xd6   : > { %p2628_p7 = por %p2627_p3, %p2626_p2 }
  0xd8   : > { %p2629_p6 = pnand %p2628_p7, %p2622_p12 }
 0x18b   : > { %v794_v15 = vpop.f32.mrf.mxu1  ;;  %v753_v17 = vpop.f32.mrf.mxu0 }
 0x18c   : > { %v804_v16 = vpack.c.bf16 %v794_v15, %v794_v15  ;;  %v802_v18 = vpack.c.bf16 %v753_v17, %v753_v17  ;;  %v2367_v15 = vld [vmem:[#allocation10] ss:$12 sps:$4 sm:$0xff]  }
 0x18d   : > { %v2119_v19 = vpop.f32.mrf.mxu1  ;;  %v755_v21 = vpop.f32.mrf.mxu0 }
 0x18e   : > { %v822_v20 = vsel %vm814_vm2, %v804_v16, 0  ;;  %v803_v23 = vpack.c.bf16 %v755_v21, %v755_v21  ;;  %v816_v28 = vsel %vm814_vm2, %v802_v18, 0  ;;  %v2373_v16 = vld [vmem:[#allocation13 + $0x34] ss:$8 sps:$4 sm:$0xff]  }
 0x18f   : > { %v797_v24 = vpop.f32.mrf.mxu1  ;;  %2122 = vmatpush3.bf16.msra.mxu1 %v822_v20  ;;  %v757_v27 = vpop.f32.mrf.mxu0 }
 0x190   : > { %2127 = vmatprep.subr.bf16.mxu1 %v2719_v0  ;;  %1998 = vmatprep.subr.msk.bf16.mxu0 %vm814_vm2, %v803_v23  ;;  %v1113_v24 = vlaneseq }
 0x191   : > { %v2120_v29 = vpop.f32.mrf.mxu1  ;;  %v758_v30 = vpop.f32.mrf.mxu0  ;;  %839 = vmatpush1.bf16.msra.mxu0 %v816_v28 }
 0x192   : > { %2124 = vmatmul.mubr.msk.bf16.vlgmr.msra.gmra.mxu1 %vm810_vm3, %v2309_v22  ;;  %1031 = vmatprep.subr.bf16.mxu0 %v2313_v26  ;;  %v3132_v29 = vshrl.u32 %v1113_v24, 7 }
 0x193   : > { %2128 = vmatpush3.bf16.msra.mxu1 %v2310_v25  ;;  %2141 = vmatprep.mubr.msk.bf16.mxu1 %vm2720_vm0, %v2719_v0 }
 0x194   : > { %2129 = vmatprep.subr.bf16.mxu1 %v2719_v0  ;;  %1999 = vmatmul.mubr.msk.bf16.vlgmr.msra.gmra.mxu0 %vm810_vm3, %v2309_v22  ;;  %vm1131_vm5 = vcmp.lt.s32.totalorder %v3132_v29, 7  ;;  %vm1120_vm6 = vcmp.lt.s32.totalorder %v3132_v29, 1  ;;  %vm1116_vm7 = vcmp.eq.s32.totalorder %v3132_v29, 0 }
 0x195   : > { %1032 = vmatpush1.bf16.msra.mxu0 %v2311_v31  ;;  %1061 = vmatprep.mubr.bf16.mxu0 %v2721_v1 }
 0x196   : > { %1033 = vmatprep.subr.bf16.mxu0 %v2317_v33 }
 0x197   : > { %2130 = vmatpush3.bf16.msra.mxu1 %v2314_v32 }
 0x198   : > { %2131 = vmatprep.subr.bf16.mxu1 %v2719_v0 }
 0x199   : > { %1034 = vmatpush1.bf16.msra.mxu0 %v2315_v34 }
 0x19a   : > { %1035 = vmatprep.subr.bf16.mxu0 %v2321_v36 }
 0x19b   : > { %2132 = vmatpush3.bf16.msra.mxu1 %v2318_v35 }
 0x19c   : > { %2133 = vmatprep.subr.bf16.mxu1 %v2719_v0 }
 0x19d   : > { %1036 = vmatpush1.bf16.msra.mxu0 %v2319_v37  ;;  %v3135_v37 = vadd.s32 8, %v3132_v29 }
 0x19e   : > { %1037 = vmatprep.subr.bf16.mxu0 %v2325_v39 }
 0x19f   : > { %2134 = vmatpush3.bf16.msra.mxu1 %v2322_v38  ;;  %vm1128_vm8 = vcmp.eq.s32.totalorder %v3135_v37, 15 }
 0x1a0   : > { %2135 = vmatprep.subr.bf16.mxu1 %v2719_v0 }
 0x1a1   : > { %1038 = vmatpush1.bf16.msra.mxu0 %v2323_v40 }
 0x1a2   : > { %1039 = vmatprep.subr.bf16.mxu0 %v2329_v42 }
 0x1a3   : > { %2136 = vmatpush3.bf16.msra.mxu1 %v2326_v41 }
 0x1a4   : > { %2137 = vmatprep.subr.bf16.mxu1 %v2719_v0 }
 0x1a5   : > { %1040 = vmatpush1.bf16.msra.mxu0 %v2327_v43 }
 0x1a6   : > { %1041 = vmatprep.subr.bf16.mxu0 %v2333_v45 }
 0x1a7   : > { %2138 = vmatpush3.bf16.msra.mxu1 %v2330_v44 }
 0x1a8   : > { %2139 = vmatprep.subr.bf16.mxu1 %v2719_v0 }
 0x1a9   : > { %1042 = vmatpush1.bf16.msra.mxu0 %v2331_v46 }
 0x1aa   : > { %1043 = vmatprep.subr.bf16.mxu0 %v2337_v48 }
 0x1ab   : > { %2140 = vmatpush3.bf16.msra.mxu1 %v2334_v47 }
 0x1ac   : > { %2145 = vmatprep.subr.bf16.mxu1 %v2719_v0 }
 0x1ad   : > { %1044 = vmatpush1.bf16.msra.mxu0 %v2335_v49 }
 0x1ae   : > { %2142 = vmatmul.mubr.msk.bf16.vlgmr.msra.gmra.mxu1 %vm1025_vm4, %v2338_v50  ;;  %1260 = vmatprep.subr.bf16.mxu0 %v2341_v52  ;;  %v2025_v52 = vld [vmem:[%s3276_s6] ss:$0 sm:$0xff] }
 0x1af   : > { %2153 = vmatprep.mubr.msk.bf16.mxu1 %vm2720_vm0, %v2719_v0  ;;  %2146 = vmatpush3.bf16.msra.mxu1 %v2342_v53 }
 0x1b0   : > { %2023 = vmatmul.mubr.msk.bf16.vlgmr.msra.gmra.mxu0 %vm1025_vm4, %v2338_v50  ;;  %2147 = vmatprep.subr.bf16.mxu1 %v2719_v0 }
 0x1b1   : > { %1284 = vmatprep.mubr.bf16.mxu0 %v2721_v1  ;;  %1261 = vmatpush1.bf16.msra.mxu0 %v2339_v51 }
 0x1b2   : > { %1262 = vmatprep.subr.bf16.mxu0 %v2345_v54 }
 0x1b3   : > { %2148 = vmatpush3.bf16.msra.mxu1 %v2346_v55 }
 0x1b4   : > { %2149 = vmatprep.subr.bf16.mxu1 %v2719_v0 }
 0x1b5   : > { %1263 = vmatpush1.bf16.msra.mxu0 %v2343_v56 }
 0x1b6   : > { %1264 = vmatprep.subr.bf16.mxu0 %v2349_v57 }
 0x1b7   : > { %2150 = vmatpush3.bf16.msra.mxu1 %v2350_v58 }
 0x1b8   : > { %2151 = vmatprep.subr.bf16.mxu1 %v2719_v0 }
 0x1b9   : > { %1265 = vmatpush1.bf16.msra.mxu0 %v2347_v59 }
 0x1ba   : > { %1266 = vmatprep.subr.bf16.mxu0 %v2353_v60 }
 0x1bb   : > { %2152 = vmatpush3.bf16.msra.mxu1 %v2354_v61 }
 0x1bc   : > { %2157 = vmatprep.subr.bf16.mxu1 %v2719_v0 }
 0x1bd   : > { %1267 = vmatpush1.bf16.msra.mxu0 %v2351_v62 }
 0x1be   : > { %1414 = vmatprep.subr.bf16.mxu0 %v2357_v3  ;;  %2154 = vmatmul.mubr.msk.bf16.vlgmr.msra.gmra.mxu1 %vm715_vm1, %v1152_v4 }
 0x1bf   : > { %2158 = vmatpush3.bf16.msra.mxu1 %v2358_v5  ;;  %2165 = vmatprep.mubr.msk.bf16.mxu1 %vm2720_vm0, %v2719_v0  ;;  %v2371_v5 = vld [vmem:[#allocation13 + $0x30] ss:$8 sps:$4 sm:$0xff]  }
 0x1c0   : > { %2038 = vmatmul.mubr.msk.bf16.vlgmr.msra.gmra.mxu0 %vm715_vm1, %v1152_v4  ;;  %2159 = vmatprep.subr.bf16.mxu1 %v2719_v0 }
 0x1c1   : > { %1415 = vmatpush1.bf16.msra.mxu0 %v2355_v6  ;;  %1438 = vmatprep.mubr.bf16.mxu0 %v2721_v1  ;;  %v2376_v6 = vld [vmem:[#allocation13 + $0x24] ss:$8 sps:$4 sm:$0xff]  }
 0x1c2   : > { %1416 = vmatprep.subr.bf16.mxu0 %v2361_v7 }
 0x1c3   : > { %2160 = vmatpush3.bf16.msra.mxu1 %v2362_v8  ;;  %v2374_v8 = vld [vmem:[#allocation13 + $0x20] ss:$8 sps:$4 sm:$0xff]  }
 0x1c4   : > { %2161 = vmatprep.subr.bf16.mxu1 %v2719_v0 }
 0x1c5   : > { %1417 = vmatpush1.bf16.msra.mxu0 %v2359_v9  ;;  %v2379_v9 = vld [vmem:[#allocation13 + $0x14] ss:$8 sps:$4 sm:$0xff]  }
 0x1c6   : > { %1418 = vmatprep.subr.bf16.mxu0 %v2365_v10  ;;  %v2377_v10 = vld [vmem:[#allocation13 + $0x10] ss:$8 sps:$4 sm:$0xff]  }
 0x1c7   : > { %2162 = vmatpush3.bf16.msra.mxu1 %v2366_v11  ;;  %v2382_v11 = vld [vmem:[#allocation13 + $0x4] ss:$8 sps:$4 sm:$0xff]  }
 0x1c8   : > { %2163 = vmatprep.subr.bf16.mxu1 %v2719_v0 }
 0x1c9   : > { %1419 = vmatpush1.bf16.msra.mxu0 %v2363_v12  ;;  %v2380_v12 = vld [vmem:[#allocation13] ss:$8 sps:$4 sm:$0xff]  }
 0x1ca   : > { %1420 = vmatprep.subr.bf16.mxu0 %v2369_v13  ;;  %v2383_v13 = vld [vmem:[#allocation14 + $0x30] ss:$8 sps:$4 sm:$0xff]  }
 0x1cb   : > { %2164 = vmatpush3.bf16.msra.mxu1 %v2370_v14  ;;  %v2385_v14 = vld [vmem:[#allocation14 + $0x34] ss:$8 sps:$4 sm:$0xff]  }
 0x1cc   : > { %1680 = vmatprep.subr.bf16.mxu1 %v2373_v16  ;;  %v2386_v16 = vld [vmem:[#allocation14 + $0x20] ss:$8 sps:$4 sm:$0xff]  }
 0x1cd   : > { %1421 = vmatpush1.bf16.msra.mxu0 %v2367_v15  ;;  %v2388_v15 = vld [vmem:[#allocation14 + $0x24] ss:$8 sps:$4 sm:$0xff]  }
 0x1ce   : > { %1597 = vmatprep.subr.bf16.mxu0 %v2385_v14 }
 0x252   : > { %v901_v17 = vpop.f32.mrf.mxu1 }
 0x254   : > { %v2125_v18 = vpop.f32.mrf.mxu1  ;;  %v858_v21 = vpop.f32.mrf.mxu0 }
 0x255   : > { %v2394_v18 = vld [vmem:[#allocation14 + $0x4] ss:$8 sps:$4 sm:$0xff]  }
 0x256   : > { %v904_v19 = vpop.f32.mrf.mxu1  ;;  %v860_v22 = vpop.f32.mrf.mxu0 }
 0x258   : > { %v2126_v20 = vpop.f32.mrf.mxu1  ;;  %v862_v23 = vpop.f32.mrf.mxu0 }
 0x25a   : > { %v864_v26 = vpop.f32.mrf.mxu0 }
 0x26e   : > { %v1106_v25 = vpop.f32.mrf.mxu1 }
 0x26f   : > { %v1107_v30 = vadd.f32 %v1106_v25, %v901_v17  ;;  %v2391_v17 = vld [vmem:[#allocation14 + $0x14] ss:$8 sps:$4 sm:$0xff]  }
 0x270   : > { %v2143_v27 = vpop.f32.mrf.mxu1  ;;  %v1063_v28 = vpop.f32.mrf.mxu0 }
 0x271   : > { %v1064_v33 = vadd.f32 %v1063_v28, %v858_v21  ;;  %v1129_v39 = vrot.slane %v1107_v30, 1 }
 0x272   : > { %v1109_v0 = vpop.f32.mrf.mxu1  ;;  %v1065_v32 = vpop.f32.mrf.mxu0 }
 0x273   : > { %v1110_v31 = vadd.f32 %v1109_v0, %v904_v19  ;;  %v1118_v41 = vrot.slane %v1064_v33, 7  ;;  %v1066_v45 = vadd.f32 %v1065_v32, %v860_v22  ;;  %v2392_v19 = vld [vmem:[#allocation14] ss:$8 sps:$4 sm:$0xff]  }
 0x274   : > { %v2144_v34 = vpop.f32.mrf.mxu1  ;;  %v1067_v36 = vpop.f32.mrf.mxu0 }
 0x275   : > { %v1130_v35 = vrot.slane %v1110_v31, 1  ;;  %v1068_v38 = vadd.f32 %v1067_v36, %v862_v23 }
 0x276   : > { %v1069_v40 = vpop.f32.mrf.mxu0 }
 0x277   : > { %v1119_v42 = vrot.slane %v1068_v38, 7  ;;  %v1070_v43 = vadd.f32 %v1069_v40, %v864_v26  ;;  %v1133_v44 = vsel %vm1131_vm5, %v1130_v35, %v1129_v39  ;;  %v1132_v53 = vsel %vm1131_vm5, %v1129_v39, %v1130_v35 }
 0x278   : > { %v1135_v51 = vsel %vm1128_vm8, 0.0, %v1133_v44 }
 0x279   : > { %v1122_v46 = vsel %vm1120_vm6, %v1119_v42, %v1118_v41  ;;  %v1121_v47 = vsel %vm1120_vm6, %v1118_v41, %v1119_v42 }
 0x27a   : > { %v1123_v48 = vsel %vm1116_vm7, 0.0, %v1122_v46  ;;  %v1126_v49 = vadd.f32 %v1121_v47, %v1070_v43 }
 0x27b   : > { %v1125_v50 = vadd.f32 %v1123_v48, %v1066_v45 }
 0x27c   : > { %v1137_v54 = vadd.f32 %v1135_v51, %v1126_v49 }
 0x27d   : > { %v1136_v55 = vadd.f32 %v1132_v53, %v1125_v50  ;;  %v2054_v50 = vld [vmem:[%s3281_s11] ss:$0 sm:$0xff] }
 0x27e   : > { %v3156_v56 = vadd.f32 %v2025_v52, %v1137_v54  ;;  %v1329_v61 = vpop.f32.mrf.mxu1 }
 0x27f   : > { %v3158_v57 = vadd.f32 %v2025_v52, %v1136_v55 }
 0x280   : > { %v1148_v58 = vmax.f32 %v3156_v56, 0.0  ;;  %v2155_v62 = vpop.f32.mrf.mxu1  ;;  %v1286_v20 = vpop.f32.mrf.mxu0 }
 0x281   : > { %v1147_v59 = vmax.f32 %v3158_v57, 0.0 }
 0x282   : > { %v1332_v3 = vpop.f32.mrf.mxu1  ;;  %v1288_v21 = vpop.f32.mrf.mxu0 }
 0x283   : > { %v1149_v60 = vpack.c.bf16 %v1148_v58, %v1147_v59 }
 0x284   : > { %v2156_v4 = vpop.f32.mrf.mxu1  ;;  %v1290_v22 = vpop.f32.mrf.mxu0 }
 0x285   : > { %1337 = vrot.lane.b32.xlu0 %v1149_v60, %s2722_s4 }
 0x286   : > { %v1292_v23 = vpop.f32.mrf.mxu0 }
 0x2f7   : > { %v1338_v7 = vpop.permute.xlu0 %1337 }
 0x2f8   : > { %2052 = vmatmul.mubr.msk.bf16.vlgmr.msra.gmra.mxu0 %vm715_vm1, %v1338_v7  ;;  %2166 = vmatmul.mubr.msk.bf16.vlgmr.msra.gmra.mxu1 %vm715_vm1, %v1338_v7 }
 0x2f9   : > { %1681 = vmatpush1.bf16.msra.mxu1 %v2371_v5  ;;  %1704 = vmatprep.mubr.bf16.mxu1 %v2721_v1 }
 0x2fa   : > { %1682 = vmatprep.subr.bf16.mxu1 %v2376_v6  ;;  %1621 = vmatprep.mubr.bf16.mxu0 %v2721_v1  ;;  %v2389_v1 = vld [vmem:[#allocation14 + $0x10] ss:$8 sps:$4 sm:$0xff]  }
 0x2fb   : > { %1598 = vmatpush1.bf16.msra.mxu0 %v2383_v13 }
 0x2fc   : > { %1599 = vmatprep.subr.bf16.mxu0 %v2388_v15 }
 0x2fd   : > { %1683 = vmatpush1.bf16.msra.mxu1 %v2374_v8 }
 0x2fe   : > { %1684 = vmatprep.subr.bf16.mxu1 %v2379_v9 }
 0x2ff   : > { %1600 = vmatpush1.bf16.msra.mxu0 %v2386_v16 }
 0x300   : > { %1601 = vmatprep.subr.bf16.mxu0 %v2391_v17 }
 0x301   : > { %1685 = vmatpush1.bf16.msra.mxu1 %v2377_v10 }
 0x302   : > { %1686 = vmatprep.subr.bf16.mxu1 %v2382_v11 }
 0x303   : > { %1602 = vmatpush1.bf16.msra.mxu0 %v2389_v1 }
 0x304   : > { %1603 = vmatprep.subr.bf16.mxu0 %v2394_v18 }
 0x305   : > { %1687 = vmatpush1.bf16.msra.mxu1 %v2380_v12 }
 0x307   : > { %1604 = vmatpush1.bf16.msra.mxu0 %v2392_v19 }
 0x308   : > { %2074 = vmatmul.mubr.msk.bf16.vlgmr.msra.gmra.mxu1 %vm715_vm1, %v1338_v7 }
 0x3b8   : > { %v1440_v24 = vpop.f32.mrf.mxu0  ;;  %v1483_v25 = vpop.f32.mrf.mxu1 }
 0x3b9   : > { %v1441_v26 = vadd.f32 %v1440_v24, %v1286_v20  ;;  %v1484_v0 = vadd.f32 %v1483_v25, %v1329_v61 }
 0x3ba   : > { %v1442_v27 = vpop.f32.mrf.mxu0  ;;  %v2167_v28 = vpop.f32.mrf.mxu1 }
 0x3bb   : > { %v1490_v34 = vrot.slane %v1441_v26, 7  ;;  %v1498_v38 = vrot.slane %v1484_v0, 1  ;;  %v1443_v42 = vadd.f32 %v1442_v27, %v1288_v21 }
 0x3bc   : > { %v1444_v30 = vpop.f32.mrf.mxu0  ;;  %v1486_v31 = vpop.f32.mrf.mxu1 }
 0x3bd   : > { %v1445_v32 = vadd.f32 %v1444_v30, %v1290_v22  ;;  %v1487_v33 = vadd.f32 %v1486_v31, %v1332_v3  ;;  %v2075_v30 = vld [vmem:[%s3282_s12] ss:$0 sm:$0xff] }
 0x3be   : > { %v1446_v35 = vpop.f32.mrf.mxu0  ;;  %v2168_v36 = vpop.f32.mrf.mxu1 }
 0x3bf   : > { %v1491_v39 = vrot.slane %v1445_v32, 7  ;;  %v1499_v40 = vrot.slane %v1487_v33, 1  ;;  %v1447_v41 = vadd.f32 %v1446_v35, %v1292_v23 }
 0x3c1   : > { %v1493_v43 = vsel %vm1120_vm6, %v1491_v39, %v1490_v34  ;;  %v1501_v44 = vsel %vm1131_vm5, %v1499_v40, %v1498_v38  ;;  %v1492_v45 = vsel %vm1120_vm6, %v1490_v34, %v1491_v39  ;;  %v1500_v51 = vsel %vm1131_vm5, %v1498_v38, %v1499_v40 }
 0x3c2   : > { %v1494_v46 = vsel %vm1116_vm7, 0.0, %v1493_v43  ;;  %v1497_v47 = vadd.f32 %v1492_v45, %v1447_v41  ;;  %v1503_v48 = vsel %vm1128_vm8, 0.0, %v1501_v44 }
 0x3c3   : > { %v1496_v49 = vadd.f32 %v1494_v46, %v1443_v42 }
 0x3c4   : > { %v1505_v52 = vadd.f32 %v1503_v48, %v1497_v47 }
 0x3c5   : > { %v1504_v53 = vadd.f32 %v1500_v51, %v1496_v49 }
 0x3c6   : > { %v1514_v54 = vadd.f32 %v2054_v50, %v1505_v52 }
 0x3c7   : > { %v1513_v55 = vadd.f32 %v2054_v50, %v1504_v53 }
 0x3c8   : > { %v2056_v60 = vmul.f32 -1.442695, %v1514_v54  ;;  %v1706_v11 = vpop.f32.mrf.mxu1 }
 0x3c9   : > { %v2055_v61 = vmul.f32 -1.442695, %v1513_v55 }
 0x3ca   : > { %2395 = vpow2.f32 %v2056_v60  ;;  %v1708_v12 = vpop.f32.mrf.mxu1 }
 0x3cb   : > { %2397 = vpow2.f32 %v2055_v61 }
 0x3cc   : > { %v1710_v16 = vpop.f32.mrf.mxu1 }
 0x3ce   : > { %v1712_v23 = vpop.f32.mrf.mxu1 }
 0x3d7   : > { %v2396_v62 = vpop.eup %2395 }
 0x3d8   : > { %v2398_v3 = vpop.eup %2397  ;;  %v1522_v4 = vadd.f32 1.0, %v2396_v62 }
 0x3d9   : > { %v1521_v5 = vadd.f32 1.0, %v2398_v3 }
 0x3da   : > { %2399 = vrcp.f32 %v1522_v4 }
 0x3db   : > { %2401 = vrcp.f32 %v1521_v5 }
 0x3e7   : > { %v2400_v6 = vpop.eup %2399 }
 0x3e8   : > { %v2402_v7 = vpop.eup %2401  ;;  %v1528_v8 = vmul.f32 %v2400_v6, %v3119_v2  ;;  %v1751_v37 = vsub.f32 1.0, %v2400_v6 }
 0x3e9   : > { %v1527_v9 = vmul.f32 %v2402_v7, %v3116_v63  ;;  %v1750_v42 = vsub.f32 1.0, %v2402_v7 }
 0x3eb   : > { %v1529_v10 = vpack.c.bf16 %v1528_v8, %v1527_v9 }
 0x3ed   : > { %2065 = vmatmul.mubr.msk.bf16.vlgmr.msra.gmra.mxu0 %vm715_vm1, %v1529_v10 }
 0x4ad   : > { %v1623_v13 = vpop.f32.mrf.mxu0 }
 0x4ae   : > { %v1707_v14 = vadd.f32 %v1706_v11, %v1623_v13 }
 0x4af   : > { %v1625_v15 = vpop.f32.mrf.mxu0 }
 0x4b0   : > { %1723 = vrot.lane.b32.xlu0 %v1707_v14, %s2722_s4  ;;  %v1715_v18 = vrot.slane %v1707_v14, 7  ;;  %v1709_v25 = vadd.f32 %v1708_v12, %v1625_v15 }
 0x4b1   : > { %v1627_v17 = vpop.f32.mrf.mxu0 }
 0x4b2   : > { %v1711_v1 = vadd.f32 %v1710_v16, %v1627_v17  ;;  %v1731_v27 = vrot.slane %v1709_v25, 1 }
 0x4b3   : > { %v1629_v22 = vpop.f32.mrf.mxu0 }
 0x4b4   : > { %v1716_v19 = vrot.slane %v1711_v1, 7  ;;  %1756 = vrot.lane.b32.xlu0 %v3119_v2, %s2722_s4  ;;  %1725 = vrot.lane.b32.xlu1 %v1711_v1, %s2722_s4  ;;  %v1713_v24 = vadd.f32 %v1712_v23, %v1629_v22 }
 0x4b6   : > { %v1718_v20 = vsel %vm1120_vm6, %v1716_v19, %v1715_v18  ;;  %v1717_v21 = vsel %vm1120_vm6, %v1715_v18, %v1716_v19  ;;  %v1732_v26 = vrot.slane %v1713_v24, 1 }
 0x4b7   : > { %v1719_v2 = vsel %vm1116_vm7, 0.0, %v1718_v20 }
 0x4b8   : > { %1754 = vrot.lane.b32.xlu1 %v3116_v63, %s2722_s4  ;;  %v1733_v31 = vsel %vm1131_vm5, %v1731_v27, %v1732_v26  ;;  %v1734_v63 = vsel %vm1131_vm5, %v1732_v26, %v1731_v27 }
 0x4b9   : > { %v1736_v36 = vsel %vm1128_vm8, 0.0, %v1734_v63 }
 0x522   : > { %v1724_v28 = vpop.permute.xlu0 %1723 }
 0x523   : > { %v1729_v0 = vadd.f32 %v1724_v28, %v1719_v2 }
 0x525   : > { %v1737_v32 = vadd.f32 %v1733_v31, %v1729_v0 }
 0x526   : > { %v1726_v33 = vpop.permute.xlu1 %1725  ;;  %v1757_v43 = vpop.permute.xlu0 %1756 }
 0x527   : > { %v1746_v34 = vadd.f32 %v2075_v30, %v1737_v32  ;;  %v1730_v35 = vadd.f32 %v1726_v33, %v1717_v21  ;;  %v1761_v49 = vmul.f32 %v1757_v43, %v1751_v37 }
 0x529   : > { %2403 = vtanh.f32 %v1746_v34  ;;  %v1738_v38 = vadd.f32 %v1736_v36, %v1730_v35 }
 0x52a   : > { %v1755_v29 = vpop.permute.xlu1 %1754 }
 0x52b   : > { %v1747_v39 = vadd.f32 %v2075_v30, %v1738_v38  ;;  %v1760_v45 = vmul.f32 %v1755_v29, %v1750_v42 }
 0x52d   : > { %2405 = vtanh.f32 %v1747_v39 }
 0x536   : > { %v2404_v40 = vpop.eup %2403 }
 0x537   : > { %1764 = vrot.lane.b32.xlu1 %v2404_v40, %s2722_s4 }
 0x53a   : > { %v2406_v41 = vpop.eup %2405 }
 0x53b   : > { %1766 = vrot.lane.b32.xlu0 %v2406_v41, %s2722_s4 }
 0x5a9   : > { %v1765_v44 = vpop.permute.xlu1 %1764 }
 0x5aa   : > { %v1770_v46 = vmul.f32 %v2402_v7, %v1765_v44 }
 0x5ac   : > { %v1772_v47 = vadd.f32 %v1770_v46, %v1760_v45 }
 0x5ad   : > { %v1767_v48 = vpop.permute.xlu0 %1766 }
 0x5ae   : > { %v1774_v50 = vsel %vm715_vm1, %v1147_v59, %v1772_v47  ;;  %v1771_v51 = vmul.f32 %v2400_v6, %v1767_v48 }
 0x5af   : > { %1776 = vst [vmem:[%s598_s1] sm:$0xff] %v1774_v50 }
 0x5b0   : > { %v1773_v52 = vadd.f32 %v1771_v51, %v1761_v49 }
 0x5b2   : > { %v1775_v53 = vsel %vm715_vm1, %v1148_v58, %v1773_v52 }
 0x5b3   : > { %1777 = vst [vmem:[%s598_s1 + $0x8] sm:$0xff] %v1775_v53 }
 0x5b4   : > { %2632 = shalt.err (!%p2629_p6)
}
 0x5b5   : > { %s2633_s22 = scalar_lea.hbm %s3224_s18, 256  ;;  %s2637_s4 = scalar_lea.hbm %s3283_s13, 512 }
 0x5b6   : > { %p2634_p0 = scmp.ne.s32.totalorder %s3224_s18, %s2633_s22  ;;  %p2638_p11 = scmp.lt.s32.totalorder %s3224_s18, %s3283_s13 }
 0x5b7   : > { %p2639_p13 = scmp.lt.s32.totalorder %s2637_s4, %s2633_s22 }
 0x5b8   : > { %p2635_p9 = pnand %p2634_p0, %p3331_p1 }
 0x5b9   : > { %p2640_p5 = por %p2639_p13, %p2638_p11 }
 0x5ba   : > { %p2636_p10 = pneg %p2635_p9 }
 0x5bc   : > { %p2641_p8 = pnand %p2640_p5, %p2636_p10 }
 0x5be   : > { %2644 = shalt.err (!%p2641_p8)
}
 0x5bf   : > { %s2724_s5 = smov 128   ;;  %s2725_s7 = smov 8  }
 0x5c0   : > { %2197 = dma.vmem_to_hbm [thread:$0]  (%p3331_p1), %s3219_s15, 256, %s3224_s18, %s1779_s14, %s2724_s5, %s2724_s5, %s2725_s7  }
 0x5c1 PF: > { %s3332_s1 = sld [smem:[#allocation27_spill]]  ;;  %s1807_s21 = sand.u32 1, %s2691_s25  }
 0x5c2   : > { %p3334_p12 = scmp.ge.s32.totalorder %s2703_s28, 2  ;;  %s1808_s30 = scalar_lea.sflag [#allocation4], %s1807_s21 }
 0x5c7   : > { %p3333_p4 = scmp.ne.s32.totalorder %s3332_s1, 0 }
 0x5c9   : > { %p2226_p2 = pnand %p3334_p12, %p3333_p4 }
 0x5cb   : > { %p2227_p3 = pneg %p2226_p2 }
 0x5cd   : > { %2686 = dma.done.wait (%p2227_p3), %s1808_s30, 256  }
 0x5ce   : > { %2688 = vsyncadd (%p2227_p3), %s1808_s30, 4294967040  ;;  %s3335_s28 = sld [smem:[#allocation25_spill]]  ;;  %s3338_s25 = smov %s2695_s26 }
 0x5cf   : > { %s3336_s8 = sld [smem:[#allocation24_spill]] }
 0x5d0   : > { %s3337_s27 = sld [smem:[#allocation26_spill]] }
 0x5d4   : > { %p32_p7 = scmp.ge.s32.totalorder %s3335_s28, 4  }
 0x5d5   : > { %s3339_s26 = smov %s3336_s8 }
 0x5d6   :  { %34 = sbr.rel (!%p32_p7) target bundleno = 18 (0x12), region = 157 }
 0x5db   :  { %1813 = vsyncpa [#allocation3], 1 }
 0x5dc   :  { %1815 = vsyncpa [#allocation3 + $0x1], 1 }
 0x5dd   :  { %1816 = vsyncpa [#allocation6], 1 }
 0x5de   :  { %1818 = vsyncpa [#allocation6 + $0x1], 1 }
 0x5df   :  { %1819 = vsyncpa [#allocation9], 1 }
 0x5e0   :  { %1820 = vsyncpa [#allocation12], 1 }
 0x5e1   :  { %1821 = vsyncpa [#allocation15], 1 }
 0x5e2   :  { %1822 = vsyncpa [#allocation4], 1 }
 0x5e3   :  { %1824 = vsyncpa [#allocation4 + $0x1], 1 }

</bundles_post_ra>
